<compile_context>
chip_gen: v7x
topology: tpu7x:2x2x1
jax: 0.10.0
libtpu: 0.0.40
codegen_flags: <defaults>
</compile_context>

<pallas_src>
import jax
import jax.numpy as jnp
from jax import lax
from jax.experimental import pallas as pl
from jax.experimental.pallas import tpu as pltpu

FEATURE_SIZE = 256      # feature_size in the PyTorch module
NUM_GROUPS = 32         # nn.GroupNorm(32, feature_size)
GN_EPS = 1e-5


# ---------------------------------------------------------------------------
# In-kernel building blocks
# ---------------------------------------------------------------------------
def _shifted_inputs(t, idx):
    """Zero-padded neighbour rows of a (L, C) f32 tile: prev[l] = t[l-1], next[l] = t[l+1]."""
    L = t.shape[0]
    prev = jnp.where(idx >= 1, jnp.roll(t, 1, axis=0), 0.0)
    nxt = jnp.where(idx <= L - 2, jnp.roll(t, -1, axis=0), 0.0)
    return prev, nxt


def _conv3(t, w_ref, b, idx):
    """Conv1d(k=3, pad=1) on a (L, C) f32 tile as 3 bf16 MXU matmuls (f32 accumulate).

    w_ref: (3, C, Cout) bf16 with w_ref[k] == torch_weight[:, :, k].T ;  b: (1, Cout) f32.
    """
    prev, nxt = _shifted_inputs(t, idx)
    y = jnp.dot(t.astype(jnp.bfloat16), w_ref[1], preferred_element_type=jnp.float32)
    y = y + jnp.dot(prev.astype(jnp.bfloat16), w_ref[0], preferred_element_type=jnp.float32)
    y = y + jnp.dot(nxt.astype(jnp.bfloat16), w_ref[2], preferred_element_type=jnp.float32)
    return y + b


def _group_norm_relu(h, A, gamma, beta):
    """GroupNorm(32) + ReLU on a (L, C) f32 tile, torch semantics (biased variance).

    A: (C, C) f32 group-averaging matrix, A[c, c'] = 1/(L*cpg) iff same group, else 0.
    """
    stats = jnp.concatenate(
        [jnp.sum(h, axis=0, keepdims=True),          # per-channel sum      (1, C)
         jnp.sum(h * h, axis=0, keepdims=True)],     # per-channel sum sq   (1, C)
        axis=0)                                      # -> (2, C)
    moments = jnp.dot(stats, A, preferred_element_type=jnp.float32)   # (2, C): [mean; E[x^2]]
    mean = moments[0:1, :]
    var = moments[1:2, :] - mean * mean
    scale = lax.rsqrt(var + GN_EPS) * gamma
    shift = beta - mean * scale
    return jnp.maximum(h * scale + shift, 0.0)


def regression_kernel(x_ref,
                      w1_ref, b1_ref, g1_ref, be1_ref, A_ref,
                      w2_ref, b2_ref, g2_ref, be2_ref,
                      w3_ref, b3_ref,
                      o_ref):
    x = x_ref[0]                                               # (L, Cin) f32
    L = x.shape[0]
    idx = lax.broadcasted_iota(jnp.int32, (L, 1), 0)
    A = A_ref[...]

    # conv1: fused single matmul (L, 3*Cin) @ (3*Cin, F)
    xp, xn = _shifted_inputs(x, idx)
    x_cat = jnp.concatenate([xp, x, xn], axis=-1).astype(jnp.bfloat16)
    h = jnp.dot(x_cat, w1_ref[...], preferred_element_type=jnp.float32) + b1_ref[...]
    h = _group_norm_relu(h, A, g1_ref[...], be1_ref[...])     # norm1 + act1

    h = _conv3(h, w2_ref, b2_ref[...], idx)                   # conv2
    h = _group_norm_relu(h, A, g2_ref[...], be2_ref[...])     # norm2 + act2

    o_ref[0] = _conv3(h, w3_ref, b3_ref[...], idx)            # regression conv (no act)


# ---------------------------------------------------------------------------
# Wrapper
# ---------------------------------------------------------------------------
def regression_model(x, params, num_anchors, data_format="NCL"):
    """x: (B, num_features_in, L) if NCL (torch layout) or (B, L, num_features_in) if NLC.

    Returns (B, L * num_anchors, 2), matching
    regression.permute(0, 2, 1).contiguous().view(B, -1, 2) in the PyTorch module.
    """
    (w1, b1, g1, be1, w2, b2, g2, be2, w3, b3) = params

    if data_format == "NCL":
        B, c_in, L = x.shape
        x_nlc = jnp.transpose(x, (0, 2, 1))        # NCL -> NLC (avoid by passing NLC upstream)
    elif data_format == "NLC":
        B, L, c_in = x.shape
        x_nlc = x
    else:
        raise ValueError(f"bad data_format {data_format!r}")

    F = w1.shape[2]
    c_out = w3.shape[2]                            # num_anchors * 2
    c_out_pad = ((c_out + 127) // 128) * 128       # lane-dense output stores

    # bf16 weights for the MXU; biases / GN affine / averaging matrix stay f32.
    w1f = w1.reshape(3 * c_in, F).astype(jnp.bfloat16)
    w2b = w2.astype(jnp.bfloat16)
    w3p = jnp.pad(w3, ((0, 0), (0, 0), (0, c_out_pad - c_out))).astype(jnp.bfloat16)
    b3p = jnp.pad(b3, ((0, 0), (0, c_out_pad - c_out)))

    # Precomputed group-averaging matrix (compile-time constant, resident in VMEM).
    cpg = F // NUM_GROUPS
    gid = jnp.arange(F, dtype=jnp.int32) // cpg
    A = (gid[:, None] == gid[None, :]).astype(jnp.float32) / float(L * cpg)

    consts = (w1f, b1, g1, be1, A, w2b, b2, g2, be2, w3p, b3p)

    def full_spec(a):
        nd = a.ndim
        return pl.BlockSpec(a.shape, lambda b, _nd=nd: (0,) * _nd)

    # VMEM budget: resident constants + double-buffered I/O blocks + activation workspace.
    const_bytes = sum(int(a.size) * a.dtype.itemsize for a in consts)
    io_bytes = 2 * L * c_in * 4 + 2 * L * c_out_pad * 4
    work_bytes = 16 * L * F * 4
    vmem_limit = int(min(max(2 * (const_bytes + io_bytes + work_bytes) + (16 << 20),
                             32 << 20), 100 << 20))

    out_padded = pl.pallas_call(
        regression_kernel,
        out_shape=jax.ShapeDtypeStruct((B, L, c_out_pad), jnp.float32),
        grid_spec=pltpu.PrefetchScalarGridSpec(
            num_scalar_prefetch=0,
            grid=(B,),
            in_specs=[pl.BlockSpec((1, L, c_in), lambda b: (b, 0, 0))]
                     + [full_spec(a) for a in consts],
            out_specs=pl.BlockSpec((1, L, c_out_pad), lambda b: (b, 0, 0)),
        ),
        compiler_params=pltpu.CompilerParams(
            dimension_semantics=("parallel",),
            vmem_limit_bytes=vmem_limit,
        ),
    )(x_nlc, *consts)

    # torch: permute(0,2,1).view(B, -1, 2)  ==  slice off padding + reshape in NLC layout
    return out_padded[:, :, :c_out].reshape(B, L * num_anchors, 2)


# ---------------------------------------------------------------------------
# Deterministic parameter init (synthetic; shapes match the nn.Module)
#   conv weights stored as (3, Cin, Cout) with w[k] == torch_weight[:, :, k].T
# ---------------------------------------------------------------------------
def init_params(key, num_features_in, feature_size, num_anchors):
    ks = jax.random.split(key, 10)
    c_out = 2 * num_anchors

    def nrm(k, shape, scale):
        return scale * jax.random.normal(k, shape, jnp.float32)

    w1 = nrm(ks[0], (3, num_features_in, feature_size), 0.10)
    b1 = nrm(ks[1], (1, feature_size), 0.10)
    g1 = 1.0 + nrm(ks[2], (1, feature_size), 0.10)
    be1 = nrm(ks[3], (1, feature_size), 0.10)
    w2 = nrm(ks[4], (3, feature_size, feature_size), 0.05)
    b2 = nrm(ks[5], (1, feature_size), 0.10)
    g2 = 1.0 + nrm(ks[6], (1, feature_size), 0.10)
    be2 = nrm(ks[7], (1, feature_size), 0.10)
    w3 = nrm(ks[8], (3, feature_size, c_out), 0.05)
    b3 = nrm(ks[9], (1, c_out), 0.10)
    return (w1, b1, g1, be1, w2, b2, g2, be2, w3, b3)


# ---------------------------------------------------------------------------
# Pure-JAX reference (mirrors the PyTorch forward).  matmul_dtype lets us check
# both the exact f32 torch math and the bf16-matmul numerics the kernel uses.
# ---------------------------------------------------------------------------
def reference(x_ncl, params, num_anchors, matmul_dtype=jnp.float32):
    (w1, b1, g1, be1, w2, b2, g2, be2, w3, b3) = params
    x = jnp.transpose(x_ncl, (0, 2, 1))            # NCL -> NLC

    def conv3(h, w, b):
        hc = h.astype(matmul_dtype)
        wc = w.astype(matmul_dtype)
        hp = jnp.pad(hc, ((0, 0), (1, 1), (0, 0)))
        y = (jnp.einsum('blc,cd->bld', hp[:, :-2], wc[0], preferred_element_type=jnp.float32)
             + jnp.einsum('blc,cd->bld', hp[:, 1:-1], wc[1], preferred_element_type=jnp.float32)
             + jnp.einsum('blc,cd->bld', hp[:, 2:], wc[2], preferred_element_type=jnp.float32))
        return y + b

    def gn(h, gamma, beta):
        B, L, C = h.shape
        hg = h.reshape(B, L, NUM_GROUPS, C // NUM_GROUPS)
        mean = hg.mean(axis=(1, 3), keepdims=True)
        var = hg.var(axis=(1, 3), keepdims=True)
        return ((hg - mean) / jnp.sqrt(var + GN_EPS)).reshape(B, L, C) * gamma + beta

    h = jax.nn.relu(gn(conv3(x, w1, b1), g1, be1))
    h = jax.nn.relu(gn(conv3(h, w2, b2), g2, be2))
    y = conv3(h, w3, b3)                           # no activation on regression output
    B, L, _ = y.shape
    return y.reshape(B, L * num_anchors, 2)


if __name__ == "__main__":
    B, C_IN, L = 2, 4, 16
    NUM_ANCHORS = 3

    key = jax.random.PRNGKey(0)
    k_x, k_p = jax.random.split(key)
    x = jax.random.normal(k_x, (B, C_IN, L), jnp.float32)      # NCL, like torch Conv1d input
    params = init_params(k_p, C_IN, FEATURE_SIZE, NUM_ANCHORS)

    out = jax.block_until_ready(regression_model(x, params, NUM_ANCHORS))
    assert out.shape == (B, L * NUM_ANCHORS, 2), out.shape

    ref_bf16 = jax.block_until_ready(reference(x, params, NUM_ANCHORS, jnp.bfloat16))
    ref_f32 = jax.block_until_ready(reference(x, params, NUM_ANCHORS, jnp.float32))
    err_bf16 = float(jnp.max(jnp.abs(out - ref_bf16)))
    err_f32 = float(jnp.max(jnp.abs(out - ref_f32)))
    # Tight check against the bf16-matmul reference (same numerics as the kernel),
    # loose sanity check against the pure-f32 torch-equivalent math.
    assert jnp.allclose(out, ref_bf16, atol=1e-2, rtol=1e-2), err_bf16
    assert jnp.allclose(out, ref_f32, atol=1e-1, rtol=1e-1), err_f32

    print("KERNEL_OK")
</pallas_src>

<mosaic_0001>
module attributes {stable_mosaic.version = 11 : i64} {
  func.func @regression_kernel(%arg0: i32, %arg1: memref<1x16x4xf32, #tpu.memory_space<vmem>>, %arg2: memref<12x256xbf16, #tpu.memory_space<vmem>>, %arg3: memref<1x256xf32, #tpu.memory_space<vmem>>, %arg4: memref<1x256xf32, #tpu.memory_space<vmem>>, %arg5: memref<1x256xf32, #tpu.memory_space<vmem>>, %arg6: memref<256x256xf32, #tpu.memory_space<vmem>>, %arg7: memref<3x256x256xbf16, #tpu.memory_space<vmem>>, %arg8: memref<1x256xf32, #tpu.memory_space<vmem>>, %arg9: memref<1x256xf32, #tpu.memory_space<vmem>>, %arg10: memref<1x256xf32, #tpu.memory_space<vmem>>, %arg11: memref<3x256x128xbf16, #tpu.memory_space<vmem>>, %arg12: memref<1x128xf32, #tpu.memory_space<vmem>>, %arg13: memref<1x16x128xf32, #tpu.memory_space<vmem>>) attributes {dimension_semantics = [#tpu.dimension_semantics<parallel>], iteration_bounds = array<i64: 2>, scalar_prefetch = 0 : i64, scratch_operands = 0 : i64, tpu.core_type = #tpu.core_type<tc>, window_params = [{transform_indices = @transform_0, window_bounds = array<i64: 1, 16, 4>}, {pipeline_mode = #tpu.pipeline_mode<synchronous>, transform_indices = @transform_1, window_bounds = array<i64: 12, 256>}, {pipeline_mode = #tpu.pipeline_mode<synchronous>, transform_indices = @transform_2, window_bounds = array<i64: 1, 256>}, {pipeline_mode = #tpu.pipeline_mode<synchronous>, transform_indices = @transform_3, window_bounds = array<i64: 1, 256>}, {pipeline_mode = #tpu.pipeline_mode<synchronous>, transform_indices = @transform_4, window_bounds = array<i64: 1, 256>}, {pipeline_mode = #tpu.pipeline_mode<synchronous>, transform_indices = @transform_5, window_bounds = array<i64: 256, 256>}, {pipeline_mode = #tpu.pipeline_mode<synchronous>, transform_indices = @transform_6, window_bounds = array<i64: 3, 256, 256>}, {pipeline_mode = #tpu.pipeline_mode<synchronous>, transform_indices = @transform_7, window_bounds = array<i64: 1, 256>}, {pipeline_mode = #tpu.pipeline_mode<synchronous>, transform_indices = @transform_8, window_bounds = array<i64: 1, 256>}, {pipeline_mode = #tpu.pipeline_mode<synchronous>, transform_indices = @transform_9, window_bounds = array<i64: 1, 256>}, {pipeline_mode = #tpu.pipeline_mode<synchronous>, transform_indices = @transform_10, window_bounds = array<i64: 3, 256, 128>}, {pipeline_mode = #tpu.pipeline_mode<synchronous>, transform_indices = @transform_11, window_bounds = array<i64: 1, 128>}, {transform_indices = @transform_12, window_bounds = array<i64: 1, 16, 128>}]} {
    %c0 = arith.constant 0 : index
    %c0_0 = arith.constant 0 : index
    %c0_1 = arith.constant 0 : index
    %0 = vector.load %arg1[%c0, %c0_0, %c0_1] : memref<1x16x4xf32, #tpu.memory_space<vmem>>, vector<1x16x4xf32>
    %1 = vector.shape_cast %0 : vector<1x16x4xf32> to vector<16x4xf32>
    %2 = tpu.iota {dimensions = array<i32: 0>} : vector<16x1xi32>
    %c0_2 = arith.constant 0 : index
    %c0_3 = arith.constant 0 : index
    %3 = vector.load %arg6[%c0_2, %c0_3] : memref<256x256xf32, #tpu.memory_space<vmem>>, vector<256x256xf32>
    %c1_i32 = arith.constant 1 : i32
    %4 = vector.broadcast %c1_i32 : i32 to vector<16x1xi32>
    %5 = arith.cmpi sge, %2, %4 : vector<16x1xi32>
    %6 = vector.extract_strided_slice %1 {offsets = [15, 0], sizes = [1, 4], strides = [1, 1]} : vector<16x4xf32> to vector<1x4xf32>
    %7 = vector.extract_strided_slice %1 {offsets = [0, 0], sizes = [15, 4], strides = [1, 1]} : vector<16x4xf32> to vector<15x4xf32>
    %8 = tpu.concatenate %6, %7 in 0 : vector<1x4xf32>, vector<15x4xf32> -> vector<16x4xf32>
    %cst = arith.constant 0.000000e+00 : f32
    %9 = vector.shape_cast %5 : vector<16x1xi1> to vector<16x1xi1>
    %10 = vector.broadcast %9 : vector<16x1xi1> to vector<16x4xi1>
    %11 = vector.broadcast %cst : f32 to vector<16x4xf32>
    %12 = arith.select %10, %8, %11 : vector<16x4xi1>, vector<16x4xf32>
    %c14_i32 = arith.constant 14 : i32
    %13 = vector.broadcast %c14_i32 : i32 to vector<16x1xi32>
    %14 = arith.cmpi sle, %2, %13 : vector<16x1xi32>
    %15 = vector.extract_strided_slice %1 {offsets = [1, 0], sizes = [15, 4], strides = [1, 1]} : vector<16x4xf32> to vector<15x4xf32>
    %16 = vector.extract_strided_slice %1 {offsets = [0, 0], sizes = [1, 4], strides = [1, 1]} : vector<16x4xf32> to vector<1x4xf32>
    %17 = tpu.concatenate %15, %16 in 0 : vector<15x4xf32>, vector<1x4xf32> -> vector<16x4xf32>
    %cst_4 = arith.constant 0.000000e+00 : f32
    %18 = vector.shape_cast %14 : vector<16x1xi1> to vector<16x1xi1>
    %19 = vector.broadcast %18 : vector<16x1xi1> to vector<16x4xi1>
    %20 = vector.broadcast %cst_4 : f32 to vector<16x4xf32>
    %21 = arith.select %19, %17, %20 : vector<16x4xi1>, vector<16x4xf32>
    %22 = tpu.concatenate %12, %1, %21 in 1 : vector<16x4xf32>, vector<16x4xf32>, vector<16x4xf32> -> vector<16x12xf32>
    %23 = arith.truncf %22 : vector<16x12xf32> to vector<16x12xbf16>
    %c0_5 = arith.constant 0 : index
    %c0_6 = arith.constant 0 : index
    %24 = vector.load %arg2[%c0_5, %c0_6] : memref<12x256xbf16, #tpu.memory_space<vmem>>, vector<12x256xbf16>
    %cst_7 = arith.constant dense<0.000000e+00> : vector<16x256xf32>
    %25 = tpu.matmul %23, %24, %cst_7 {dimension_numbers = #tpu.dot_dimension_numbers<[1], [0], [0], [1], [0, 0, 1, 1], [], []>} : vector<16x12xbf16>, vector<12x256xbf16>, vector<16x256xf32> -> vector<16x256xf32>
    %c0_8 = arith.constant 0 : index
    %c0_9 = arith.constant 0 : index
    %26 = vector.load %arg3[%c0_8, %c0_9] : memref<1x256xf32, #tpu.memory_space<vmem>>, vector<1x256xf32>
    %27 = vector.broadcast %26 : vector<1x256xf32> to vector<16x256xf32>
    %28 = arith.addf %25, %27 : vector<16x256xf32>
    %c0_10 = arith.constant 0 : index
    %c0_11 = arith.constant 0 : index
    %29 = vector.load %arg4[%c0_10, %c0_11] : memref<1x256xf32, #tpu.memory_space<vmem>>, vector<1x256xf32>
    %c0_12 = arith.constant 0 : index
    %c0_13 = arith.constant 0 : index
    %30 = vector.load %arg5[%c0_12, %c0_13] : memref<1x256xf32, #tpu.memory_space<vmem>>, vector<1x256xf32>
    %cst_14 = arith.constant dense<0.000000e+00> : vector<256xf32>
    %31 = vector.multi_reduction <add>, %28, %cst_14 [0] : vector<16x256xf32> to vector<256xf32>
    %32 = vector.shape_cast %31 : vector<256xf32> to vector<1x256xf32>
    %33 = arith.mulf %28, %28 : vector<16x256xf32>
    %cst_15 = arith.constant dense<0.000000e+00> : vector<256xf32>
    %34 = vector.multi_reduction <add>, %33, %cst_15 [0] : vector<16x256xf32> to vector<256xf32>
    %35 = vector.shape_cast %34 : vector<256xf32> to vector<1x256xf32>
    %36 = tpu.concatenate %32, %35 in 0 : vector<1x256xf32>, vector<1x256xf32> -> vector<2x256xf32>
    %cst_16 = arith.constant dense<0.000000e+00> : vector<2x256xf32>
    %37 = tpu.matmul %36, %3, %cst_16 {dimension_numbers = #tpu.dot_dimension_numbers<[1], [0], [0], [1], [0, 0, 1, 1], [], []>} : vector<2x256xf32>, vector<256x256xf32>, vector<2x256xf32> -> vector<2x256xf32>
    %38 = vector.extract_strided_slice %37 {offsets = [0, 0], sizes = [1, 256], strides = [1, 1]} : vector<2x256xf32> to vector<1x256xf32>
    %39 = vector.extract_strided_slice %37 {offsets = [1, 0], sizes = [1, 256], strides = [1, 1]} : vector<2x256xf32> to vector<1x256xf32>
    %40 = arith.mulf %38, %38 : vector<1x256xf32>
    %41 = arith.subf %39, %40 : vector<1x256xf32>
    %cst_17 = arith.constant 9.99999974E-6 : f32
    %42 = vector.broadcast %cst_17 : f32 to vector<1x256xf32>
    %43 = arith.addf %41, %42 : vector<1x256xf32>
    %44 = math.rsqrt %43 : vector<1x256xf32>
    %45 = arith.mulf %44, %29 : vector<1x256xf32>
    %46 = arith.mulf %38, %45 : vector<1x256xf32>
    %47 = arith.subf %30, %46 : vector<1x256xf32>
    %48 = vector.broadcast %45 : vector<1x256xf32> to vector<16x256xf32>
    %49 = arith.mulf %28, %48 : vector<16x256xf32>
    %50 = vector.broadcast %47 : vector<1x256xf32> to vector<16x256xf32>
    %51 = arith.addf %49, %50 : vector<16x256xf32>
    %cst_18 = arith.constant 0.000000e+00 : f32
    %52 = vector.broadcast %cst_18 : f32 to vector<16x256xf32>
    %53 = arith.maximumf %51, %52 : vector<16x256xf32>
    %c0_19 = arith.constant 0 : index
    %c0_20 = arith.constant 0 : index
    %54 = vector.load %arg8[%c0_19, %c0_20] : memref<1x256xf32, #tpu.memory_space<vmem>>, vector<1x256xf32>
    %c1_i32_21 = arith.constant 1 : i32
    %55 = vector.broadcast %c1_i32_21 : i32 to vector<16x1xi32>
    %56 = arith.cmpi sge, %2, %55 : vector<16x1xi32>
    %57 = vector.extract_strided_slice %53 {offsets = [15, 0], sizes = [1, 256], strides = [1, 1]} : vector<16x256xf32> to vector<1x256xf32>
    %58 = vector.extract_strided_slice %53 {offsets = [0, 0], sizes = [15, 256], strides = [1, 1]} : vector<16x256xf32> to vector<15x256xf32>
    %59 = tpu.concatenate %57, %58 in 0 : vector<1x256xf32>, vector<15x256xf32> -> vector<16x256xf32>
    %cst_22 = arith.constant 0.000000e+00 : f32
    %60 = vector.shape_cast %56 : vector<16x1xi1> to vector<16x1xi1>
    %61 = vector.broadcast %60 : vector<16x1xi1> to vector<16x256xi1>
    %62 = vector.broadcast %cst_22 : f32 to vector<16x256xf32>
    %63 = arith.select %61, %59, %62 : vector<16x256xi1>, vector<16x256xf32>
    %c14_i32_23 = arith.constant 14 : i32
    %64 = vector.broadcast %c14_i32_23 : i32 to vector<16x1xi32>
    %65 = arith.cmpi sle, %2, %64 : vector<16x1xi32>
    %66 = vector.extract_strided_slice %53 {offsets = [1, 0], sizes = [15, 256], strides = [1, 1]} : vector<16x256xf32> to vector<15x256xf32>
    %67 = vector.extract_strided_slice %53 {offsets = [0, 0], sizes = [1, 256], strides = [1, 1]} : vector<16x256xf32> to vector<1x256xf32>
    %68 = tpu.concatenate %66, %67 in 0 : vector<15x256xf32>, vector<1x256xf32> -> vector<16x256xf32>
    %cst_24 = arith.constant 0.000000e+00 : f32
    %69 = vector.shape_cast %65 : vector<16x1xi1> to vector<16x1xi1>
    %70 = vector.broadcast %69 : vector<16x1xi1> to vector<16x256xi1>
    %71 = vector.broadcast %cst_24 : f32 to vector<16x256xf32>
    %72 = arith.select %70, %68, %71 : vector<16x256xi1>, vector<16x256xf32>
    %73 = arith.truncf %53 : vector<16x256xf32> to vector<16x256xbf16>
    %c1 = arith.constant 1 : index
    %c0_25 = arith.constant 0 : index
    %c0_26 = arith.constant 0 : index
    %74 = vector.load %arg7[%c1, %c0_25, %c0_26] : memref<3x256x256xbf16, #tpu.memory_space<vmem>>, vector<1x256x256xbf16>
    %75 = vector.shape_cast %74 : vector<1x256x256xbf16> to vector<256x256xbf16>
    %cst_27 = arith.constant dense<0.000000e+00> : vector<16x256xf32>
    %76 = tpu.matmul %73, %75, %cst_27 {dimension_numbers = #tpu.dot_dimension_numbers<[1], [0], [0], [1], [0, 0, 1, 1], [], []>} : vector<16x256xbf16>, vector<256x256xbf16>, vector<16x256xf32> -> vector<16x256xf32>
    %77 = arith.truncf %63 : vector<16x256xf32> to vector<16x256xbf16>
    %c0_28 = arith.constant 0 : index
    %c0_29 = arith.constant 0 : index
    %c0_30 = arith.constant 0 : index
    %78 = vector.load %arg7[%c0_28, %c0_29, %c0_30] : memref<3x256x256xbf16, #tpu.memory_space<vmem>>, vector<1x256x256xbf16>
    %79 = vector.shape_cast %78 : vector<1x256x256xbf16> to vector<256x256xbf16>
    %cst_31 = arith.constant dense<0.000000e+00> : vector<16x256xf32>
    %80 = tpu.matmul %77, %79, %cst_31 {dimension_numbers = #tpu.dot_dimension_numbers<[1], [0], [0], [1], [0, 0, 1, 1], [], []>} : vector<16x256xbf16>, vector<256x256xbf16>, vector<16x256xf32> -> vector<16x256xf32>
    %81 = arith.addf %76, %80 : vector<16x256xf32>
    %82 = arith.truncf %72 : vector<16x256xf32> to vector<16x256xbf16>
    %c2 = arith.constant 2 : index
    %c0_32 = arith.constant 0 : index
    %c0_33 = arith.constant 0 : index
    %83 = vector.load %arg7[%c2, %c0_32, %c0_33] : memref<3x256x256xbf16, #tpu.memory_space<vmem>>, vector<1x256x256xbf16>
    %84 = vector.shape_cast %83 : vector<1x256x256xbf16> to vector<256x256xbf16>
    %cst_34 = arith.constant dense<0.000000e+00> : vector<16x256xf32>
    %85 = tpu.matmul %82, %84, %cst_34 {dimension_numbers = #tpu.dot_dimension_numbers<[1], [0], [0], [1], [0, 0, 1, 1], [], []>} : vector<16x256xbf16>, vector<256x256xbf16>, vector<16x256xf32> -> vector<16x256xf32>
    %86 = arith.addf %81, %85 : vector<16x256xf32>
    %87 = vector.broadcast %54 : vector<1x256xf32> to vector<16x256xf32>
    %88 = arith.addf %86, %87 : vector<16x256xf32>
    %c0_35 = arith.constant 0 : index
    %c0_36 = arith.constant 0 : index
    %89 = vector.load %arg9[%c0_35, %c0_36] : memref<1x256xf32, #tpu.memory_space<vmem>>, vector<1x256xf32>
    %c0_37 = arith.constant 0 : index
    %c0_38 = arith.constant 0 : index
    %90 = vector.load %arg10[%c0_37, %c0_38] : memref<1x256xf32, #tpu.memory_space<vmem>>, vector<1x256xf32>
    %cst_39 = arith.constant dense<0.000000e+00> : vector<256xf32>
    %91 = vector.multi_reduction <add>, %88, %cst_39 [0] : vector<16x256xf32> to vector<256xf32>
    %92 = vector.shape_cast %91 : vector<256xf32> to vector<1x256xf32>
    %93 = arith.mulf %88, %88 : vector<16x256xf32>
    %cst_40 = arith.constant dense<0.000000e+00> : vector<256xf32>
    %94 = vector.multi_reduction <add>, %93, %cst_40 [0] : vector<16x256xf32> to vector<256xf32>
    %95 = vector.shape_cast %94 : vector<256xf32> to vector<1x256xf32>
    %96 = tpu.concatenate %92, %95 in 0 : vector<1x256xf32>, vector<1x256xf32> -> vector<2x256xf32>
    %cst_41 = arith.constant dense<0.000000e+00> : vector<2x256xf32>
    %97 = tpu.matmul %96, %3, %cst_41 {dimension_numbers = #tpu.dot_dimension_numbers<[1], [0], [0], [1], [0, 0, 1, 1], [], []>} : vector<2x256xf32>, vector<256x256xf32>, vector<2x256xf32> -> vector<2x256xf32>
    %98 = vector.extract_strided_slice %97 {offsets = [0, 0], sizes = [1, 256], strides = [1, 1]} : vector<2x256xf32> to vector<1x256xf32>
    %99 = vector.extract_strided_slice %97 {offsets = [1, 0], sizes = [1, 256], strides = [1, 1]} : vector<2x256xf32> to vector<1x256xf32>
    %100 = arith.mulf %98, %98 : vector<1x256xf32>
    %101 = arith.subf %99, %100 : vector<1x256xf32>
    %cst_42 = arith.constant 9.99999974E-6 : f32
    %102 = vector.broadcast %cst_42 : f32 to vector<1x256xf32>
    %103 = arith.addf %101, %102 : vector<1x256xf32>
    %104 = math.rsqrt %103 : vector<1x256xf32>
    %105 = arith.mulf %104, %89 : vector<1x256xf32>
    %106 = arith.mulf %98, %105 : vector<1x256xf32>
    %107 = arith.subf %90, %106 : vector<1x256xf32>
    %108 = vector.broadcast %105 : vector<1x256xf32> to vector<16x256xf32>
    %109 = arith.mulf %88, %108 : vector<16x256xf32>
    %110 = vector.broadcast %107 : vector<1x256xf32> to vector<16x256xf32>
    %111 = arith.addf %109, %110 : vector<16x256xf32>
    %cst_43 = arith.constant 0.000000e+00 : f32
    %112 = vector.broadcast %cst_43 : f32 to vector<16x256xf32>
    %113 = arith.maximumf %111, %112 : vector<16x256xf32>
    %c0_44 = arith.constant 0 : index
    %c0_45 = arith.constant 0 : index
    %114 = vector.load %arg12[%c0_44, %c0_45] : memref<1x128xf32, #tpu.memory_space<vmem>>, vector<1x128xf32>
    %c1_i32_46 = arith.constant 1 : i32
    %115 = vector.broadcast %c1_i32_46 : i32 to vector<16x1xi32>
    %116 = arith.cmpi sge, %2, %115 : vector<16x1xi32>
    %117 = vector.extract_strided_slice %113 {offsets = [15, 0], sizes = [1, 256], strides = [1, 1]} : vector<16x256xf32> to vector<1x256xf32>
    %118 = vector.extract_strided_slice %113 {offsets = [0, 0], sizes = [15, 256], strides = [1, 1]} : vector<16x256xf32> to vector<15x256xf32>
    %119 = tpu.concatenate %117, %118 in 0 : vector<1x256xf32>, vector<15x256xf32> -> vector<16x256xf32>
    %cst_47 = arith.constant 0.000000e+00 : f32
    %120 = vector.shape_cast %116 : vector<16x1xi1> to vector<16x1xi1>
    %121 = vector.broadcast %120 : vector<16x1xi1> to vector<16x256xi1>
    %122 = vector.broadcast %cst_47 : f32 to vector<16x256xf32>
    %123 = arith.select %121, %119, %122 : vector<16x256xi1>, vector<16x256xf32>
    %c14_i32_48 = arith.constant 14 : i32
    %124 = vector.broadcast %c14_i32_48 : i32 to vector<16x1xi32>
    %125 = arith.cmpi sle, %2, %124 : vector<16x1xi32>
    %126 = vector.extract_strided_slice %113 {offsets = [1, 0], sizes = [15, 256], strides = [1, 1]} : vector<16x256xf32> to vector<15x256xf32>
    %127 = vector.extract_strided_slice %113 {offsets = [0, 0], sizes = [1, 256], strides = [1, 1]} : vector<16x256xf32> to vector<1x256xf32>
    %128 = tpu.concatenate %126, %127 in 0 : vector<15x256xf32>, vector<1x256xf32> -> vector<16x256xf32>
    %cst_49 = arith.constant 0.000000e+00 : f32
    %129 = vector.shape_cast %125 : vector<16x1xi1> to vector<16x1xi1>
    %130 = vector.broadcast %129 : vector<16x1xi1> to vector<16x256xi1>
    %131 = vector.broadcast %cst_49 : f32 to vector<16x256xf32>
    %132 = arith.select %130, %128, %131 : vector<16x256xi1>, vector<16x256xf32>
    %133 = arith.truncf %113 : vector<16x256xf32> to vector<16x256xbf16>
    %c1_50 = arith.constant 1 : index
    %c0_51 = arith.constant 0 : index
    %c0_52 = arith.constant 0 : index
    %134 = vector.load %arg11[%c1_50, %c0_51, %c0_52] : memref<3x256x128xbf16, #tpu.memory_space<vmem>>, vector<1x256x128xbf16>
    %135 = vector.shape_cast %134 : vector<1x256x128xbf16> to vector<256x128xbf16>
    %cst_53 = arith.constant dense<0.000000e+00> : vector<16x128xf32>
    %136 = tpu.matmul %133, %135, %cst_53 {dimension_numbers = #tpu.dot_dimension_numbers<[1], [0], [0], [1], [0, 0, 1, 1], [], []>} : vector<16x256xbf16>, vector<256x128xbf16>, vector<16x128xf32> -> vector<16x128xf32>
    %137 = arith.truncf %123 : vector<16x256xf32> to vector<16x256xbf16>
    %c0_54 = arith.constant 0 : index
    %c0_55 = arith.constant 0 : index
    %c0_56 = arith.constant 0 : index
    %138 = vector.load %arg11[%c0_54, %c0_55, %c0_56] : memref<3x256x128xbf16, #tpu.memory_space<vmem>>, vector<1x256x128xbf16>
    %139 = vector.shape_cast %138 : vector<1x256x128xbf16> to vector<256x128xbf16>
    %cst_57 = arith.constant dense<0.000000e+00> : vector<16x128xf32>
    %140 = tpu.matmul %137, %139, %cst_57 {dimension_numbers = #tpu.dot_dimension_numbers<[1], [0], [0], [1], [0, 0, 1, 1], [], []>} : vector<16x256xbf16>, vector<256x128xbf16>, vector<16x128xf32> -> vector<16x128xf32>
    %141 = arith.addf %136, %140 : vector<16x128xf32>
    %142 = arith.truncf %132 : vector<16x256xf32> to vector<16x256xbf16>
    %c2_58 = arith.constant 2 : index
    %c0_59 = arith.constant 0 : index
    %c0_60 = arith.constant 0 : index
    %143 = vector.load %arg11[%c2_58, %c0_59, %c0_60] : memref<3x256x128xbf16, #tpu.memory_space<vmem>>, vector<1x256x128xbf16>
    %144 = vector.shape_cast %143 : vector<1x256x128xbf16> to vector<256x128xbf16>
    %cst_61 = arith.constant dense<0.000000e+00> : vector<16x128xf32>
    %145 = tpu.matmul %142, %144, %cst_61 {dimension_numbers = #tpu.dot_dimension_numbers<[1], [0], [0], [1], [0, 0, 1, 1], [], []>} : vector<16x256xbf16>, vector<256x128xbf16>, vector<16x128xf32> -> vector<16x128xf32>
    %146 = arith.addf %141, %145 : vector<16x128xf32>
    %147 = vector.broadcast %114 : vector<1x128xf32> to vector<16x128xf32>
    %148 = arith.addf %146, %147 : vector<16x128xf32>
    %c0_62 = arith.constant 0 : index
    %c0_63 = arith.constant 0 : index
    %c0_64 = arith.constant 0 : index
    %149 = vector.load %arg13[%c0_62, %c0_63, %c0_64] : memref<1x16x128xf32, #tpu.memory_space<vmem>>, vector<1x16x128xf32>
    %150 = vector.shape_cast %149 : vector<1x16x128xf32> to vector<16x128xf32>
    %151 = vector.shape_cast %148 : vector<16x128xf32> to vector<1x16x128xf32>
    tpu.vector_store %arg13[%c0_62, %c0_63, %c0_64], %151 {strides = array<i32>} : memref<1x16x128xf32, #tpu.memory_space<vmem>>, vector<1x16x128xf32>,
    return
  }
  func.func @transform_0(%arg0: i32) -> (i32, i32, i32) {
    %c0_i32 = arith.constant 0 : i32
    %c0_i32_0 = arith.constant 0 : i32
    %c0_i32_1 = arith.constant 0 : i32
    return %arg0, %c0_i32, %c0_i32_0 : i32, i32, i32
  }
  func.func @transform_1(%arg0: i32) -> (i32, i32) {
    %c0_i32 = arith.constant 0 : i32
    %c0_i32_0 = arith.constant 0 : i32
    %c0_i32_1 = arith.constant 0 : i32
    return %c0_i32, %c0_i32_0 : i32, i32
  }
  func.func @transform_2(%arg0: i32) -> (i32, i32) {
    %c0_i32 = arith.constant 0 : i32
    %c0_i32_0 = arith.constant 0 : i32
    %c0_i32_1 = arith.constant 0 : i32
    return %c0_i32, %c0_i32_0 : i32, i32
  }
  func.func @transform_3(%arg0: i32) -> (i32, i32) {
    %c0_i32 = arith.constant 0 : i32
    %c0_i32_0 = arith.constant 0 : i32
    %c0_i32_1 = arith.constant 0 : i32
    return %c0_i32, %c0_i32_0 : i32, i32
  }
  func.func @transform_4(%arg0: i32) -> (i32, i32) {
    %c0_i32 = arith.constant 0 : i32
    %c0_i32_0 = arith.constant 0 : i32
    %c0_i32_1 = arith.constant 0 : i32
    return %c0_i32, %c0_i32_0 : i32, i32
  }
  func.func @transform_5(%arg0: i32) -> (i32, i32) {
    %c0_i32 = arith.constant 0 : i32
    %c0_i32_0 = arith.constant 0 : i32
    %c0_i32_1 = arith.constant 0 : i32
    return %c0_i32, %c0_i32_0 : i32, i32
  }
  func.func @transform_6(%arg0: i32) -> (i32, i32, i32) {
    %c0_i32 = arith.constant 0 : i32
    %c0_i32_0 = arith.constant 0 : i32
    %c0_i32_1 = arith.constant 0 : i32
    %c0_i32_2 = arith.constant 0 : i32
    return %c0_i32, %c0_i32_0, %c0_i32_1 : i32, i32, i32
  }
  func.func @transform_7(%arg0: i32) -> (i32, i32) {
    %c0_i32 = arith.constant 0 : i32
    %c0_i32_0 = arith.constant 0 : i32
    %c0_i32_1 = arith.constant 0 : i32
    return %c0_i32, %c0_i32_0 : i32, i32
  }
  func.func @transform_8(%arg0: i32) -> (i32, i32) {
    %c0_i32 = arith.constant 0 : i32
    %c0_i32_0 = arith.constant 0 : i32
    %c0_i32_1 = arith.constant 0 : i32
    return %c0_i32, %c0_i32_0 : i32, i32
  }
  func.func @transform_9(%arg0: i32) -> (i32, i32) {
    %c0_i32 = arith.constant 0 : i32
    %c0_i32_0 = arith.constant 0 : i32
    %c0_i32_1 = arith.constant 0 : i32
    return %c0_i32, %c0_i32_0 : i32, i32
  }
  func.func @transform_10(%arg0: i32) -> (i32, i32, i32) {
    %c0_i32 = arith.constant 0 : i32
    %c0_i32_0 = arith.constant 0 : i32
    %c0_i32_1 = arith.constant 0 : i32
    %c0_i32_2 = arith.constant 0 : i32
    return %c0_i32, %c0_i32_0, %c0_i32_1 : i32, i32, i32
  }
  func.func @transform_11(%arg0: i32) -> (i32, i32) {
    %c0_i32 = arith.constant 0 : i32
    %c0_i32_0 = arith.constant 0 : i32
    %c0_i32_1 = arith.constant 0 : i32
    return %c0_i32, %c0_i32_0 : i32, i32
  }
  func.func @transform_12(%arg0: i32) -> (i32, i32, i32) {
    %c0_i32 = arith.constant 0 : i32
    %c0_i32_0 = arith.constant 0 : i32
    %c0_i32_1 = arith.constant 0 : i32
    return %arg0, %c0_i32, %c0_i32_0 : i32, i32, i32
  }
}

</mosaic_0001>

<bundles_post_ra>
// kernel: tpu_custom_call.1
= control target key start
LH: loop header
LB: loop body
LE: loop exit
PB: predicated region body
PF: predicated region fallthrough
CT: control target
= control target key end

     0   :  { %s3958_s0 = inlined_call_operand.vmem [shape: f32[2,16,4], index: 0, kind: input, shape index: {}]   ;;  %s3959_s1 = inlined_call_operand.vmem [shape: bf16[12,256], index: 1, kind: input, shape index: {}]   ;;  %s3960_s2 = inlined_call_operand.vmem [shape: f32[1,256], index: 2, kind: input, shape index: {}]   ;;  %s3961_s3 = inlined_call_operand.vmem [shape: f32[1,256], index: 3, kind: input, shape index: {}]   ;;  %s3962_s4 = inlined_call_operand.vmem [shape: f32[1,256], index: 4, kind: input, shape index: {}]   ;;  %s3963_s5 = inlined_call_operand.hbm [shape: f32[256,256], index: 5, kind: input, shape index: {}]   ;;  %s3964_s6 = inlined_call_operand.hbm [shape: bf16[3,256,256], index: 6, kind: input, shape index: {}]   ;;  %s3965_s7 = inlined_call_operand.vmem [shape: f32[1,256], index: 7, kind: input, shape index: {}]   ;;  %s3966_s8 = inlined_call_operand.vmem [shape: f32[1,256], index: 8, kind: input, shape index: {}]   ;;  %s3967_s9 = inlined_call_operand.vmem [shape: f32[1,256], index: 9, kind: input, shape index: {}]   ;;  %s3968_s10 = inlined_call_operand.hbm [shape: bf16[3,256,128], index: 10, kind: input, shape index: {}]   ;;  %s3969_s11 = inlined_call_operand.vmem [shape: f32[1,128], index: 11, kind: input, shape index: {}]   ;;  %s3970_s12 = inlined_call_operand.hbm [shape: f32[2,16,128], index: 12, kind: output, shape index: {}]  }
   0x1   :  { %3983 = sst [smem:[#allocation20_spill]] %s3964_s6 }
   0x2   :  { %3984 = sst [smem:[#allocation21_spill]] %s3970_s12 }
   0x3   :  { %17 = vsyncpa [#allocation3], 0 }
   0x4   :  { %18 = vsyncpa [#allocation6], 0 }
   0x5   :  { %19 = vsyncpa [#allocation4], 0 }
   0x6   :  { %21 = vsyncpa [#allocation4 + $0x1], 0  ;;  %s3416_s21 = smov 0   ;;  %s3418_s22 = smov 0  }
   0x7   :  { %s3420_s23 = smov 0   ;;  %s3422_s24 = smov 0  }
   0x8 LB: > { %3985 = sst [smem:[#allocation12_spill]] %s3321_s21  ;;  %s3437_s25 = sadd.s32 4294967295, %s3333_s24   ;;  %s3333_s24 = sphi %s3422_s24, %s4016_s24   ;;  %s3329_s23 = sphi %s3420_s23, %s4021_s23   ;;  %s3325_s22 = sphi %s3418_s22, %s4020_s22   ;;  %s3321_s21 = sphi %s3416_s21, %s4019_s21  }
   0x9   : > { %3986 = sst [smem:[#allocation13_spill]] %s3329_s23  ;;  %s2489_s26 = sadd.s32 4294967294, %s3333_s24  }
   0xa   : > { %3987 = sst [smem:[#allocation14_spill]] %s3333_s24  ;;  %s3441_s27 = sadd.s32 1, %s3333_s24  }
   0xb   : > { %3988 = sst [smem:[#allocation15_spill]] %s3441_s27  ;;  %s291_s28 = sadd.s32 1, %s3329_s23 }
   0xc   : > { %s288_s29 = ssub.s32 %s3333_s24, %s3441_s27  ;;  %p301_p0 = scmp.ne.s32.totalorder %s3329_s23, %s3325_s22 }
   0xd   : > { %p289_p1 = scmp.eq.s32.totalorder %s288_s29, 0  ;;  %p302_p2 = scmp.eq.s32.totalorder %s3437_s25, 1 }
   0xe   : > { %p307_p3 = scmp.ne.s32.totalorder %s3325_s22, %s3321_s21  ;;  %p308_p4 = scmp.eq.s32.totalorder %s2489_s26, 1 }
   0xf   : > { %s3452_s30 = scalar_select %p289_p1, %s3329_s23, %s291_s28  }
  0x10   : > { %p3454_p5 = por %p302_p2, %p301_p0  ;;  %p3458_p6 = por %p308_p4, %p307_p3 }
  0x11   : > { %3989 = sst [smem:[#allocation16_spill]] %s3452_s30  ;;  %p2490_p7 = scmp.ge.s32.totalorder %s3333_s24, 1 }
  0x12   : > { %s3990_s13 = scalar_select %p3454_p5, 1, 0 }
  0x13   : > { %s3991_s14 = scalar_select %p3458_p6, 1, 0 }
  0x14   : > { %p315_p8 = scmp.lt.s32.totalorder %s3333_s24, 3  ;;  %p3974_p9 = scmp.eq.s32.totalorder %s3437_s25, 0 }
  0x15   : > { %3992 = sst [smem:[#allocation17_spill]] %s3991_s14  ;;  %s3335_s16 = smov [#allocation5]  }
  0x16   : > { %p3465_p10 = pnand %p2490_p7, %p315_p8  ;;  %s352_s17 = sshll.u32 %s3335_s16, 4  ;;  %s353_s17 = int_to_ptr.vmem [resolvable:$true] %s352_s17 }
  0x17   : > { %s3336_s19 = smov [#allocation2]   ;;  %s3995_s6 = sld [smem:[#allocation20_spill]] }
  0x18   : > { %s3993_s15 = scalar_select %p3465_p10, 1, 0 }
  0x19   : > { %p2898_p11 = pneg %p3465_p10  ;;  %s339_s20 = sshll.u32 %s3336_s19, 4  ;;  %s3477_s20 = int_to_ptr.vmem [resolvable:$true] %s339_s20 }
  0x1b   : > { %p3473_p12 = pnand %p3974_p9, %p2898_p11 }
  0x1d   : > { %s3179_s29 = scalar_lea.hbm %s3995_s6, 12288  ;;  %p3487_p0 = pneg %p3473_p12 }
  0x1e   : > { %p3180_p13 = scmp.ne.s32.totalorder %s3995_s6, %s3179_s29  ;;  %p3186_p3 = scmp.lt.u32.totalorder %s3179_s29, %s3995_s6 }
  0x20   : > { %p3182_p1 = pnand %p3487_p0, %p3180_p13 }
  0x22   : > { %p3183_p2 = pneg %p3182_p1 }
  0x24   : > { %p3188_p4 = pnand %p3186_p3, %p3183_p2 }
  0x26   : > { %3191 = shalt.err (!%p3188_p4)
}
  0x27   : > { %s3192_s26 = scalar_lea.vmem %s353_s17, 12288  ;;  %p3200_p9 = scmp.lt.s32.totalorder %s353_s17, %s353_s17 }
  0x28   : > { %p3193_p7 = scmp.ne.s32.totalorder %s353_s17, %s3192_s26  ;;  %p3201_p6 = scmp.lt.s32.totalorder %s3192_s26, %s3192_s26 }
  0x2a   : > { %p3195_p8 = pnand %p3193_p7, %p3487_p0  ;;  %p3202_p5 = por %p3201_p6, %p3200_p9 }
  0x2c   : > { %p3196_p11 = pneg %p3195_p8 }
  0x2e   : > { %p3203_p10 = pnand %p3202_p5, %p3196_p11 }
  0x30   : > { %3206 = shalt.err (!%p3203_p10)
}
  0x31   : > { %s3337_s23 = smov 128   ;;  %s3338_s30 = smov 8  }
  0x32   : > { %2904 = dma.hbm_to_vmem [thread:$0]  (!%p3473_p12), %s3995_s6, 12288, %s353_s17, [#allocation6], %s3337_s23, %s3337_s23, %s3338_s30  }
  0x33   : > { %s3207_s14 = scalar_lea.hbm %s3963_s5, 8192 }
  0x34   : > { %p3208_p13 = scmp.ne.s32.totalorder %s3963_s5, %s3207_s14  ;;  %p3214_p9 = scmp.lt.u32.totalorder %s3207_s14, %s3963_s5 }
  0x36   : > { %p3210_p5 = pnand %p3208_p13, %p3487_p0 }
  0x38   : > { %p3211_p6 = pneg %p3210_p5 }
  0x3a   : > { %p3216_p10 = pnand %p3214_p9, %p3211_p6 }
  0x3c   : > { %3219 = shalt.err (!%p3216_p10)
}
  0x3d   : > { %s3220_s17 = scalar_lea.vmem %s3477_s20, 8192  ;;  %p3228_p4 = scmp.lt.s32.totalorder %s3477_s20, %s3477_s20 }
  0x3e   : > { %p3221_p1 = scmp.ne.s32.totalorder %s3477_s20, %s3220_s17  ;;  %p3229_p7 = scmp.lt.s32.totalorder %s3220_s17, %s3220_s17 }
  0x40   : > { %p3223_p2 = pnand %p3221_p1, %p3487_p0  ;;  %p3230_p8 = por %p3229_p7, %p3228_p4 }
  0x42   : > { %p3224_p3 = pneg %p3223_p2 }
  0x44   : > { %p3231_p11 = pnand %p3230_p8, %p3224_p3 }
  0x46   : > { %3234 = shalt.err (!%p3231_p11)
}
  0x47   : > { %s3339_s21 = smov 256   ;;  %s3340_s12 = smov 16  }
  0x48   : > { %2901 = dma.hbm_to_vmem [thread:$0]  (!%p3473_p12), %s3963_s5, 8192, %s3477_s20, [#allocation3], %s3339_s21, %s3339_s21, %s3340_s12  }
  0x49   : > { %s3341_s23 = smov [#allocation7]   ;;  %s3235_s29 = scalar_lea.hbm %s3968_s10, 6144 }
  0x4a   : > { %s374_s30 = sshll.u32 %s3341_s23, 4  ;;  %p3236_p13 = scmp.ne.s32.totalorder %s3968_s10, %s3235_s29  ;;  %s375_s30 = int_to_ptr.vmem [resolvable:$true] %s374_s30 }
  0x4b   : > { %p3242_p9 = scmp.lt.u32.totalorder %s3235_s29, %s3968_s10 }
  0x4c   : > { %p3238_p5 = pnand %p3236_p13, %p3487_p0 }
  0x4e   : > { %p3239_p6 = pneg %p3238_p5 }
  0x50   : > { %p3244_p10 = pnand %p3242_p9, %p3239_p6 }
  0x52   : > { %3247 = shalt.err (!%p3244_p10)
}
  0x53   : > { %s3248_s20 = scalar_lea.vmem %s375_s30, 6144  ;;  %p3256_p4 = scmp.lt.s32.totalorder %s375_s30, %s375_s30 }
  0x54   : > { %p3249_p1 = scmp.ne.s32.totalorder %s375_s30, %s3248_s20  ;;  %p3257_p7 = scmp.lt.s32.totalorder %s3248_s20, %s3248_s20 }
  0x56   : > { %p3251_p2 = pnand %p3249_p1, %p3487_p0  ;;  %p3258_p8 = por %p3257_p7, %p3256_p4 }
  0x58   : > { %p3252_p3 = pneg %p3251_p2 }
  0x5a   : > { %p3259_p11 = pnand %p3258_p8, %p3252_p3 }
  0x5c   : > { %3262 = shalt.err (!%p3259_p11)
}
  0x5d   : > { %s3342_s21 = smov 64   ;;  %s3343_s12 = smov 4  }
  0x5e   : > { %2907 = dma.hbm_to_vmem [thread:$0]  (!%p3473_p12), %s3968_s10, 6144, %s375_s30, [#allocation6], %s3342_s21, %s3342_s21, %s3343_s12  }
  0x5f   : > { %p3997_p13 = scmp.ne.s32.totalorder %s3993_s15, 0 }
  0x61   : > { %401 = sbr.rel (%p3997_p13) target bundleno = 1659 (0x67b), region = 68 }
  0x68   : > { %p3998_p5 = scmp.eq.s32.totalorder %s3437_s25, 0 }
  0x6a   : > { %3308 = dma.done.wait (%p3998_p5), [#allocation3], 8192   ;;  %p3999_p0 = pmov %p3998_p5 }
  0x6c   : > { %3310 = vsyncadd (%p3999_p0), [#allocation3], 4294959104  ;;  %p4000_p6 = pmov %p3999_p0 }
  0x6d   : > { %p4001_p9 = pmov %p3999_p0 }
  0x6e   : > { %3312 = dma.done.wait (%p4000_p6), [#allocation6], 18432  }
  0x6f   : > { %3314 = vsyncadd (%p4001_p9), [#allocation6], 4294948864  ;;  %p451_p10 = scmp.lt.s32.totalorder %s3437_s25, 1  ;;  %v459_v0 = vlaneseq  ;;  %vm546_vm0 = vcmask 1046528   ;;  %v3344_v3 = vmov 0   ;;  %vm532_vm2 = vcmask 1040384  }
  0x70   : > { %646 = vmatprep.mubr.bf16.mxu0 %v3344_v3  ;;  %vm607_vm3 = vcmask 1045504   ;;  %v463_v10 = vld [vmem:[#allocation2 + $0x8] sm:$0xff]  ;;  %v2976_v12 = vld [vmem:[%s3959_s1 + $0x4] ss:$8 sps:$4 sm:$0x3f]   ;;  %v462_v14 = vld [vmem:[#allocation2] sm:$0xff] }
  0x71   : > { %s452_s18 = scalar_select %p451_p10, %s3437_s25, 1  ;;  %v3556_v1 = vshrl.u32 %v459_v0, 7  ;;  %v465_v13 = vld [vmem:[#allocation2 + $0x18] sm:$0xff]  ;;  %v464_v19 = vld [vmem:[#allocation2 + $0x10] sm:$0xff]  ;;  %v467_v20 = vld [vmem:[#allocation2 + $0x28] sm:$0xff]  ;;  %2504 = vmatprep.subr.msk.bf16.mxu0 %vm607_vm3, %v2976_v12  ;;  %vm574_vm5 = vcmask 31744  }
  0x72   : > { %s3345_s28 = smov 4   ;;  %v2978_v17 = vld [vmem:[%s3959_s1] ss:$8 sps:$4 sm:$0x3f]   ;;  %v3577_v18 = vpack.c.bf16 %v465_v13, %v463_v10  ;;  %v3582_v23 = vpack.c.bf16 %v464_v19, %v462_v14  ;;  %v466_v25 = vld [vmem:[#allocation2 + $0x20] sm:$0xff]  ;;  %v471_v30 = vld [vmem:[#allocation2 + $0x48] sm:$0xff] }
  0x73   : > { %s2680_s15 = sshll.u32 %s452_s18, 4  ;;  %v3559_v2 = vadd.s32 8, %v3556_v1  ;;  %v469_v24 = vld [vmem:[#allocation2 + $0x38] sm:$0xff]  ;;  %v468_v26 = vld [vmem:[#allocation2 + $0x30] sm:$0xff]  ;;  %v609_v28 = vsel %vm607_vm3, %v2978_v17, 0  ;;  %v470_v35 = vld [vmem:[#allocation2 + $0x40] sm:$0xff] }
  0x74   : > { %s455_s23 = scalar_lea.vmem %s3958_s0, %s2680_s15  ;;  %2749 = vmatprep.subr.bf16.mxu1 %v3577_v18  ;;  %v3588_v29 = vpack.c.bf16 %v469_v24, %v467_v20  ;;  %v473_v31 = vld [vmem:[#allocation2 + $0x58] sm:$0xff]  ;;  %615 = vmatpush1.bf16.msra.mxu0 %v609_v28  ;;  %v3591_v33 = vpack.c.bf16 %v468_v26, %v466_v25  ;;  %v472_v36 = vld [vmem:[#allocation2 + $0x50] sm:$0xff]  ;;  %s3346_s26 = smov 8   ;;  %v475_v37 = vld [vmem:[#allocation2 + $0x68] sm:$0xff]  ;;  %vm526_vm4 = vcmp.ge.s32.totalorder %v3556_v1, 1  ;;  %vm577_vm6 = vcmask 64512  }
  0x75   : > { %4002 = vst [vmem:[#allocation18_spill] sm:$0xff] %v3559_v2  ;;  %v457_v4 = vld [vmem:[%s455_s23] sm:$0xff]  ;;  %v458_v5 = vld [vmem:[%s455_s23 + $0x8] sm:$0xff]  ;;  %vm545_vm1 = vcmp.le.s32.totalorder %v3559_v2, 14  ;;  %2751 = vmatpush1.bf16.msra.mxu1 %v3582_v23  ;;  %v3594_v34 = vpack.c.bf16 %v473_v31, %v471_v30  ;;  %v3598_v39 = vpack.c.bf16 %v472_v36, %v470_v35  ;;  %v474_v41 = vld [vmem:[#allocation2 + $0x60] sm:$0xff]  ;;  %vm603_vm7 = vcmask 97280  }
  0x76   : > { %v529_v6 = vrot.slane %v458_v5, 7  ;;  %v548_v7 = vrot.slane %v458_v5, 1  ;;  %v2966_v8 = vpack.i.bf16 %v458_v5, %v457_v4  ;;  %v533_v9 = vrot.slane %v457_v4, 7  ;;  %2753 = vmatprep.subr.bf16.mxu1 %v3588_v29  ;;  %v477_v38 = vld [vmem:[#allocation2 + $0x78] sm:$0xff]  ;;  %v476_v42 = vld [vmem:[#allocation2 + $0x70] sm:$0xff]  ;;  %v479_v43 = vld [vmem:[#allocation2 + $0x88] sm:$0xff] }
  0x77   : > { %v547_v11 = vrot.slane %v457_v4, 1  ;;  %v3601_v40 = vpack.c.bf16 %v477_v38, %v475_v37  ;;  %v481_v44 = vld [vmem:[#allocation2 + $0x98] sm:$0xff]  ;;  %v3604_v45 = vpack.c.bf16 %v476_v42, %v474_v41  ;;  %v478_v46 = vld [vmem:[#allocation2 + $0x80] sm:$0xff]  ;;  %v480_v48 = vld [vmem:[#allocation2 + $0x90] sm:$0xff]  ;;  %vm3348_vm8 = vmmov 1   ;;  %s448_s27 = sand.u32 1, %s3325_s22  }
  0x78   : > { %2967 = vrot.lane.b32.xlu0 %v2966_v8, %s3345_s28  ;;  %v3569_v15 = vsel %vm532_vm2, %v533_v9, %v529_v6  ;;  %v3572_v16 = vsel %vm532_vm2, %v529_v6, %v533_v9  ;;  %v3607_v47 = vpack.c.bf16 %v481_v44, %v479_v43  ;;  %v483_v49 = vld [vmem:[#allocation2 + $0xa8] sm:$0xff]  ;;  %v485_v50 = vld [vmem:[#allocation2 + $0xb8] sm:$0xff]  ;;  %v482_v51 = vld [vmem:[#allocation2 + $0xa0] sm:$0xff]  ;;  %v3610_v53 = vpack.c.bf16 %v480_v48, %v478_v46  ;;  %s2499_s28 = sshll.u32 %s448_s27, 4  ;;  %s2681_s21 = sshll.u32 %s3437_s25, 8 }
  0x79   : > { %v549_v21 = vsel %vm546_vm0, %v547_v11, %v548_v7  ;;  %v553_v22 = vsel %vm546_vm0, %v548_v7, %v547_v11  ;;  %2755 = vmatpush1.bf16.msra.mxu1 %v3591_v33  ;;  %v484_v52 = vld [vmem:[#allocation2 + $0xb0] sm:$0xff]  ;;  %v487_v54 = vld [vmem:[#allocation2 + $0xc8] sm:$0xff]  ;;  %v489_v55 = vld [vmem:[#allocation2 + $0xd8] sm:$0xff]  ;;  %v3613_v56 = vpack.c.bf16 %v485_v50, %v483_v49  ;;  %v542_v25 = vsel %vm526_vm4, %v3572_v16, 0.0  ;;  %s450_s17 = scalar_lea.vmem [#allocation8], %s2499_s28  ;;  %s4010_s6 = sld [smem:[#allocation21_spill]] }
  0x7a   : > { %v559_v27 = vsel %vm545_vm1, %v553_v22, 0.0  ;;  %2757 = vmatprep.subr.bf16.mxu1 %v3594_v34  ;;  %v486_v57 = vld [vmem:[#allocation2 + $0xc0] sm:$0xff]  ;;  %v488_v58 = vld [vmem:[#allocation2 + $0xd0] sm:$0xff]  ;;  %v3616_v59 = vpack.c.bf16 %v484_v52, %v482_v51  ;;  %v491_v60 = vld [vmem:[#allocation2 + $0xe8] sm:$0xff]  ;;  %v3619_v62 = vpack.c.bf16 %v489_v55, %v487_v54  ;;  %s2396_s20 = sshll.u32 %s450_s17, 4  ;;  %s3916_s15 = scalar_lea.sflag [#allocation4], %s448_s27  ;;  %s3909_s20 = int_to_ptr.vmem [resolvable:$true] %s2396_s20 }
  0x7b   : > { %v2971_v32 = vpack.i.bf16 %v559_v27, %v549_v21  ;;  %v493_v61 = vld [vmem:[#allocation2 + $0xf8] sm:$0xff]  ;;  %v490_v63 = vld [vmem:[#allocation2 + $0xe0] sm:$0xff]  ;;  %v492_v0 = vld [vmem:[#allocation2 + $0xf0] sm:$0xff]  ;;  %v3622_v3 = vpack.c.bf16 %v488_v58, %v486_v57  ;;  %s3263_s16 = scalar_lea.vmem %s3909_s20, 256  ;;  %p4011_p1 = scmp.ne.s32.totalorder %s3990_s13, 0 }
  0x7c   : > { %v495_v4 = vld [vmem:[#allocation2 + $0x108] sm:$0xff]  ;;  %v497_v5 = vld [vmem:[#allocation2 + $0x118] sm:$0xff]  ;;  %v3625_v6 = vpack.c.bf16 %v493_v61, %v491_v60  ;;  %v494_v7 = vld [vmem:[#allocation2 + $0x100] sm:$0xff]  ;;  %v3628_v9 = vpack.c.bf16 %v492_v0, %v490_v63  ;;  %p3264_p12 = scmp.ne.s32.totalorder %s3909_s20, %s3263_s16  ;;  %s3349_s25 = smov [#allocation8]  }
  0x7d   : > { %2972 = vrot.lane.b32.xlu0 %v2971_v32, %s3346_s26  ;;  %2759 = vmatpush1.bf16.msra.mxu1 %v3598_v39  ;;  %v496_v8 = vld [vmem:[#allocation2 + $0x110] sm:$0xff]  ;;  %v499_v10 = vld [vmem:[#allocation2 + $0x128] sm:$0xff]  ;;  %v501_v11 = vld [vmem:[#allocation2 + $0x138] sm:$0xff]  ;;  %v3631_v12 = vpack.c.bf16 %v497_v5, %v495_v4  ;;  %s3267_s14 = sshll.u32 %s3349_s25, 4  ;;  %s3268_s14 = int_to_ptr.vmem [resolvable:$false] %s3267_s14 }
  0x7e   : > { %2761 = vmatprep.subr.bf16.mxu1 %v3601_v40  ;;  %v498_v13 = vld [vmem:[#allocation2 + $0x120] sm:$0xff]  ;;  %v500_v14 = vld [vmem:[#allocation2 + $0x130] sm:$0xff]  ;;  %v3634_v17 = vpack.c.bf16 %v496_v8, %v494_v7  ;;  %v3637_v19 = vpack.c.bf16 %v501_v11, %v499_v10  ;;  %v503_v37 = vld [vmem:[#allocation2 + $0x148] sm:$0xff]  ;;  %p3265_p2 = pnand %p3264_p12, %p4011_p1  ;;  %s3269_s23 = scalar_lea.vmem %s3268_s14, 512 }
  0x7f   : > { %v3640_v20 = vpack.c.bf16 %v500_v14, %v498_v13  ;;  %v505_v38 = vld [vmem:[#allocation2 + $0x158] sm:$0xff]  ;;  %v502_v42 = vld [vmem:[#allocation2 + $0x140] sm:$0xff]  ;;  %v504_v43 = vld [vmem:[#allocation2 + $0x150] sm:$0xff]  ;;  %s3914_s18 = scalar_lea.hbm %s4010_s6, %s2681_s21  ;;  %p3270_p4 = scmp.lt.s32.totalorder %s3909_s20, %s3268_s14 }
  0x80   : > { %v3649_v41 = vpack.c.bf16 %v505_v38, %v503_v37  ;;  %v3651_v44 = vpack.c.bf16 %v504_v43, %v502_v42  ;;  %v507_v16 = vld [vmem:[#allocation2 + $0x168] sm:$0xff]  ;;  %v509_v46 = vld [vmem:[#allocation2 + $0x178] sm:$0xff]  ;;  %v506_v48 = vld [vmem:[#allocation2 + $0x160] sm:$0xff]  ;;  %p3266_p3 = pneg %p3265_p2  ;;  %p3271_p7 = scmp.lt.s32.totalorder %s3269_s23, %s3263_s16 }
  0x81   : > { %2763 = vmatpush1.bf16.msra.mxu1 %v3604_v45  ;;  %v508_v49 = vld [vmem:[#allocation2 + $0x170] sm:$0xff]  ;;  %v511_v51 = vld [vmem:[#allocation2 + $0x188] sm:$0xff]  ;;  %v513_v52 = vld [vmem:[#allocation2 + $0x198] sm:$0xff] }
  0x82   : > { %2765 = vmatprep.subr.bf16.mxu1 %v3607_v47  ;;  %v3657_v50 = vpack.c.bf16 %v508_v49, %v506_v48  ;;  %v3661_v54 = vpack.c.bf16 %v513_v52, %v511_v51  ;;  %v510_v55 = vld [vmem:[#allocation2 + $0x180] sm:$0xff]  ;;  %v512_v57 = vld [vmem:[#allocation2 + $0x190] sm:$0xff]  ;;  %v515_v60 = vld [vmem:[#allocation2 + $0x1a8] sm:$0xff]  ;;  %p3272_p8 = por %p3271_p7, %p3270_p4 }
  0x83   : > { %v3663_v58 = vpack.c.bf16 %v512_v57, %v510_v55  ;;  %v517_v61 = vld [vmem:[#allocation2 + $0x1b8] sm:$0xff]  ;;  %v514_v0 = vld [vmem:[#allocation2 + $0x1a0] sm:$0xff]  ;;  %v516_v4 = vld [vmem:[#allocation2 + $0x1b0] sm:$0xff] }
  0x84   : > { %v3667_v63 = vpack.c.bf16 %v517_v61, %v515_v60  ;;  %v3669_v5 = vpack.c.bf16 %v516_v4, %v514_v0  ;;  %v519_v7 = vld [vmem:[#allocation2 + $0x1c8] sm:$0xff]  ;;  %v521_v8 = vld [vmem:[#allocation2 + $0x1d8] sm:$0xff]  ;;  %v518_v10 = vld [vmem:[#allocation2 + $0x1c0] sm:$0xff]  ;;  %p3273_p11 = pnand %p3272_p8, %p3266_p3 }
  0x85   : > { %2767 = vmatpush1.bf16.msra.mxu1 %v3610_v53  ;;  %v3672_v11 = vpack.c.bf16 %v521_v8, %v519_v7  ;;  %v520_v13 = vld [vmem:[#allocation2 + $0x1d0] sm:$0xff]  ;;  %v523_v14 = vld [vmem:[#allocation2 + $0x1e8] sm:$0xff]  ;;  %vm3784_vm9 = vmpackc.low %vm3348_vm8, %vm526_vm4 }
  0x86   : > { %2769 = vmatprep.subr.bf16.mxu1 %v3613_v56  ;;  %v2990_v37 = vld [vmem:[#allocation5 + $0x34] ss:$8 sps:$4 sm:$0xff]   ;;  %v2988_v38 = vld [vmem:[#allocation5 + $0x30] ss:$8 sps:$4 sm:$0xff]   ;;  %v2993_v42 = vld [vmem:[#allocation5 + $0x44] ss:$8 sps:$4 sm:$0xff]  }
  0x87   : > { %v2991_v43 = vld [vmem:[#allocation5 + $0x40] ss:$8 sps:$4 sm:$0xff]   ;;  %vm3815_vm10 = vmpackc.low %vm545_vm1, %vm3348_vm8 }
  0x89   : > { %2771 = vmatpush1.bf16.msra.mxu1 %v3616_v59 }
  0x8a   : > { %2773 = vmatprep.subr.bf16.mxu1 %v3619_v62 }
  0x8d   : > { %2775 = vmatpush1.bf16.msra.mxu1 %v3622_v3 }
  0x8e   : > { %2777 = vmatprep.subr.bf16.mxu1 %v3625_v6 }
  0x91   : > { %2779 = vmatpush1.bf16.msra.mxu1 %v3628_v9 }
  0x92   : > { %2781 = vmatprep.subr.bf16.mxu1 %v3631_v12 }
  0x95   : > { %2783 = vmatpush1.bf16.msra.mxu1 %v3634_v17 }
  0x96   : > { %2785 = vmatprep.subr.bf16.mxu1 %v3637_v19 }
  0x99   : > { %2787 = vmatpush1.bf16.msra.mxu1 %v3640_v20 }
  0x9a   : > { %2789 = vmatprep.subr.bf16.mxu1 %v3649_v41 }
  0x9d   : > { %2791 = vmatpush1.bf16.msra.mxu1 %v3651_v44 }
  0xea   : > { %v2968_v21 = vpop.permute.xlu0 %2967 }
  0xeb   : > { %v2970_v22 = vunpack.i.h.bf16 %v2968_v21  ;;  %v2969_v24 = vunpack.i.l.bf16 %v2968_v21  ;;  %v525_v21 = vld [vmem:[#allocation2 + $0x1f8] sm:$0xff] }
  0xed   : > { %v575_v30 = vsel %vm574_vm5, %v542_v25, %v2969_v24  ;;  %v576_v31 = vsel %vm574_vm5, %v3569_v15, %v2970_v22  ;;  %v3655_v15 = vpack.c.bf16 %v509_v46, %v507_v16  ;;  %v3675_v22 = vpack.c.bf16 %v520_v13, %v518_v10  ;;  %v522_v25 = vld [vmem:[#allocation2 + $0x1e0] sm:$0xff]  ;;  %v583_v46 = vld [vmem:[%s3960_s2] sm:$0x3] }
  0xee   : > { %v3678_v24 = vpack.c.bf16 %v525_v21, %v523_v14  ;;  %v3690_v16 = vsub.s32 1, %v3556_v1 }
  0xef   : > { %v2973_v26 = vpop.permute.xlu0 %2972  ;;  %2793 = vmatprep.subr.bf16.mxu1 %v3655_v15 }
  0xf0   : > { %v2975_v27 = vunpack.i.h.bf16 %v2973_v26  ;;  %v2974_v28 = vunpack.i.l.bf16 %v2973_v26  ;;  %2795 = vmatpush1.bf16.msra.mxu1 %v3657_v50  ;;  %v524_v26 = vld [vmem:[#allocation2 + $0x1f0] sm:$0xff]  ;;  %v592_v49 = vrot.slane %v583_v46, %v3690_v16 }
  0xf1   : > { %2797 = vmatprep.subr.bf16.mxu1 %v3661_v54 }
  0xf2   : > { %v578_v32 = vsel %vm577_vm6, %v575_v30, %v2974_v28  ;;  %v579_v35 = vsel %vm577_vm6, %v576_v31, %v2975_v27  ;;  %v3681_v27 = vpack.c.bf16 %v524_v26, %v522_v25  ;;  %v2979_v28 = vld [vmem:[#allocation5] ss:$8 sps:$4 sm:$0xff]   ;;  %v2981_v30 = vld [vmem:[#allocation5 + $0x4] ss:$8 sps:$4 sm:$0xff]   ;;  %v2984_v31 = vld [vmem:[#allocation5 + $0x14] ss:$8 sps:$4 sm:$0xff]  }
  0xf3   : > { %v580_v36 = vpack.c.bf16 %v579_v35, %v578_v32  ;;  %1119 = vmatprep.subr.bf16.mxu0 %v2981_v30  ;;  %v2982_v32 = vld [vmem:[#allocation5 + $0x10] ss:$8 sps:$4 sm:$0xff]   ;;  %v2987_v35 = vld [vmem:[#allocation5 + $0x24] ss:$8 sps:$4 sm:$0xff]  }
  0xf4   : > { %2799 = vmatpush1.bf16.msra.mxu1 %v3663_v58 }
  0xf5   : > { %2505 = vmatmul.mubr.msk.bf16.vlgmr.msra.gmra.mrb[0].mxu0 %vm603_vm7, %v580_v36  ;;  %2801 = vmatprep.subr.bf16.mxu1 %v3667_v63  ;;  %v2985_v36 = vld [vmem:[#allocation5 + $0x20] ss:$8 sps:$4 sm:$0xff]  }
  0xf6   : > { %1120 = vmatpush1.bf16.msra.mxu0 %v2979_v28 }
  0xf7   : > { %1121 = vmatprep.subr.bf16.mxu0 %v2984_v31 }
  0xf8   : > { %2803 = vmatpush1.bf16.msra.mxu1 %v3669_v5 }
  0xf9   : > { %2805 = vmatprep.subr.bf16.mxu1 %v3672_v11 }
  0xfa   : > { %1122 = vmatpush1.bf16.msra.mxu0 %v2982_v32 }
  0xfb   : > { %1123 = vmatprep.subr.bf16.mxu0 %v2987_v35 }
  0xfc   : > { %2807 = vmatpush1.bf16.msra.mxu1 %v3675_v22 }
  0xfd   : > { %2809 = vmatprep.subr.bf16.mxu1 %v3678_v24 }
  0xfe   : > { %1124 = vmatpush1.bf16.msra.mxu0 %v2985_v36 }
  0xff   : > { %1125 = vmatprep.subr.bf16.mxu0 %v2990_v37 }
 0x100   : > { %2811 = vmatpush1.bf16.msra.mxu1 %v3681_v27 }
 0x101   : > { %2813 = vmatprep.subr.bf16.mxu1 %v3577_v18  ;;  %v3687_v18 = vsub.s32 0, %v3556_v1 }
 0x102   : > { %1126 = vmatpush1.bf16.msra.mxu0 %v2988_v38 }
 0x103   : > { %1127 = vmatprep.subr.bf16.mxu0 %v2993_v42  ;;  %v588_v48 = vrot.slane %v583_v46, %v3687_v18 }
 0x106   : > { %1128 = vmatpush1.bf16.msra.mxu0 %v2991_v43 }
 0x1c8   : > { %v648_v51 = vpop.f32.mrb[0].mxu0 }
 0x1c9   : > { %v3697_v52 = vadd.f32 %v648_v51, %v588_v48  ;;  %v650_v55 = vpop.f32.mrb[1].mxu0 }
 0x1ca   : > { %v3699_v57 = vadd.f32 %v650_v55, %v592_v49  ;;  %v652_v60 = vpop.f32.mrb[2].mxu0 }
 0x1cb   : > { %v3701_v61 = vadd.f32 %v652_v60, %v588_v48  ;;  %v654_v0 = vpop.f32.mrb[3].mxu0  ;;  %v673_v7 = vmul.f32 %v3697_v52, %v3697_v52 }
 0x1cc   : > { %v3703_v4 = vadd.f32 %v654_v0, %v592_v49  ;;  %v674_v13 = vmul.f32 %v3699_v57, %v3699_v57 }
 0x1cd   : > { %v659_v8 = vadd.f32 %v3701_v61, %v3697_v52  ;;  %v675_v10 = vmul.f32 %v3701_v61, %v3701_v61 }
 0x1ce   : > { %4003 = vst [vmem:[#allocation19_spill] sm:$0xff] %v3703_v4  ;;  %v666_v14 = vadd.f32 %v3703_v4, %v3699_v57  ;;  %v676_v21 = vmul.f32 %v3703_v4, %v3703_v4 }
 0x1cf   : > { %v660_v25 = vrot.slane %v659_v8, 4  ;;  %v677_v26 = vadd.f32 %v675_v10, %v673_v7 }
 0x1d0   : > { %v667_v28 = vrot.slane %v666_v14, 4  ;;  %v684_v30 = vadd.f32 %v676_v21, %v674_v13 }
 0x1d1   : > { %v661_v31 = vadd.f32 %v660_v25, %v659_v8  ;;  %v678_v32 = vrot.slane %v677_v26, 4 }
 0x1d2   : > { %v668_v35 = vadd.f32 %v667_v28, %v666_v14  ;;  %v685_v36 = vrot.slane %v684_v30, 4 }
 0x1d3   : > { %v662_v37 = vrot.slane %v661_v31, 2  ;;  %v679_v38 = vadd.f32 %v678_v32, %v677_v26  ;;  %v657_v26 = vld [vmem:[%s3961_s3] sm:$0x3] }
 0x1d4   : > { %v669_v42 = vrot.slane %v668_v35, 2  ;;  %v686_v43 = vadd.f32 %v685_v36, %v684_v30  ;;  %v782_v28 = vrot.slane %v657_v26, %v3687_v18  ;;  %v786_v30 = vrot.slane %v657_v26, %v3690_v16 }
 0x1d5   : > { %v663_v46 = vadd.f32 %v662_v37, %v661_v31  ;;  %v680_v48 = vrot.slane %v679_v38, 2  ;;  %v3347_v31 = vmov 1966171168  }
 0x1d6   : > { %v670_v49 = vadd.f32 %v669_v42, %v668_v35  ;;  %v687_v51 = vrot.slane %v686_v43, 2  ;;  %v803_v32 = vunpack.c.l.s4 %v3347_v31  ;;  %v3038_v31 = vld [vmem:[#allocation5 + $0x134] ss:$8 sps:$4 sm:$0xff]  }
 0x1d7   : > { %v681_v55 = vadd.f32 %v680_v48, %v679_v38  ;;  %v664_v2 = vrot.slane %v663_v46, 1 }
 0x1d8   : > { %v671_v60 = vrot.slane %v670_v49, 1  ;;  %v688_v0 = vadd.f32 %v687_v51, %v686_v43  ;;  %v804_v42 = vunpack.c.0.s8 %v803_v32  ;;  %v3036_v32 = vld [vmem:[#allocation5 + $0x130] ss:$8 sps:$4 sm:$0xff]  }
 0x1d9   : > { %v682_v4 = vrot.slane %v681_v55, 1  ;;  %v665_v21 = vadd.f32 %v664_v2, %v663_v46  ;;  %v2996_v2 = vld [vmem:[#allocation5 + $0x54] ss:$8 sps:$4 sm:$0xff]  }
 0x1da   : > { %v689_v7 = vrot.slane %v688_v0, 1  ;;  %v672_v13 = vadd.f32 %v671_v60, %v670_v49  ;;  %1129 = vmatprep.subr.bf16.mxu0 %v2996_v2  ;;  %v3756_v51 = vsub.s32 %v804_v42, %v3556_v1  ;;  %v4004_v2 = vld [vmem:[#allocation19_spill] sm:$0xff] }
 0x1db   : > { %v683_v10 = vadd.f32 %v682_v4, %v681_v55  ;;  %v3047_v42 = vld [vmem:[#allocation5 + $0x164] ss:$8 sps:$4 sm:$0xff]  }
 0x1dc   : > { %v690_v8 = vadd.f32 %v689_v7, %v688_v0  ;;  %v658_v7 = vld [vmem:[%s3962_s4] sm:$0x3] }
 0x1dd   : > { %v691_v25 = vsel %vm532_vm2, %v665_v21, %v683_v10 }
 0x1de   : > { %v692_v14 = vsel %vm532_vm2, %v672_v13, %v690_v8 }
 0x1df   : > { %757 = vmatprep.mubr.f32.mxu1 %v692_v14 }
 0x1e0   : > { %758 = vmatmul.mubr.f32.vlgmr.msra.gmra.mrb[0].mxu1 %v691_v25 }
 0x1e1   : > { %2815 = vmatpush1.bf16.msra.mxu1 %v3582_v23  ;;  %v2994_v23 = vld [vmem:[#allocation5 + $0x50] ss:$8 sps:$4 sm:$0xff]  }
 0x1e2   : > { %2817 = vmatprep.subr.bf16.mxu1 %v3588_v29  ;;  %1130 = vmatpush1.bf16.msra.mxu0 %v2994_v23  ;;  %v2999_v29 = vld [vmem:[#allocation5 + $0x64] ss:$8 sps:$4 sm:$0xff]  }
 0x1e3   : > { %1131 = vmatprep.subr.bf16.mxu0 %v2999_v29 }
 0x1e5   : > { %2819 = vmatpush1.bf16.msra.mxu1 %v3591_v33  ;;  %v2997_v33 = vld [vmem:[#allocation5 + $0x60] ss:$8 sps:$4 sm:$0xff]  }
 0x1e6   : > { %2821 = vmatprep.subr.bf16.mxu1 %v3594_v34  ;;  %1132 = vmatpush1.bf16.msra.mxu0 %v2997_v33  ;;  %v3002_v34 = vld [vmem:[#allocation5 + $0x74] ss:$8 sps:$4 sm:$0xff]  }
 0x1e7   : > { %1133 = vmatprep.subr.bf16.mxu0 %v3002_v34 }
 0x1e9   : > { %2823 = vmatpush1.bf16.msra.mxu1 %v3598_v39  ;;  %v3000_v39 = vld [vmem:[#allocation5 + $0x70] ss:$8 sps:$4 sm:$0xff]  }
 0x1ea   : > { %2825 = vmatprep.subr.bf16.mxu1 %v3601_v40  ;;  %1134 = vmatpush1.bf16.msra.mxu0 %v3000_v39  ;;  %v3005_v40 = vld [vmem:[#allocation5 + $0x84] ss:$8 sps:$4 sm:$0xff]  }
 0x1eb   : > { %1135 = vmatprep.subr.bf16.mxu0 %v3005_v40 }
 0x1ed   : > { %2827 = vmatpush1.bf16.msra.mxu1 %v3604_v45  ;;  %v3003_v45 = vld [vmem:[#allocation5 + $0x80] ss:$8 sps:$4 sm:$0xff]  }
 0x1ee   : > { %2829 = vmatprep.subr.bf16.mxu1 %v3607_v47  ;;  %1136 = vmatpush1.bf16.msra.mxu0 %v3003_v45  ;;  %v3008_v47 = vld [vmem:[#allocation5 + $0x94] ss:$8 sps:$4 sm:$0xff]  }
 0x1ef   : > { %1137 = vmatprep.subr.bf16.mxu0 %v3008_v47 }
 0x1f1   : > { %2831 = vmatpush1.bf16.msra.mxu1 %v3610_v53  ;;  %v3006_v53 = vld [vmem:[#allocation5 + $0x90] ss:$8 sps:$4 sm:$0xff]  }
 0x1f2   : > { %2833 = vmatprep.subr.bf16.mxu1 %v3613_v56  ;;  %1138 = vmatpush1.bf16.msra.mxu0 %v3006_v53  ;;  %v3011_v56 = vld [vmem:[#allocation5 + $0xa4] ss:$8 sps:$4 sm:$0xff]  }
 0x1f3   : > { %1139 = vmatprep.subr.bf16.mxu0 %v3011_v56 }
 0x1f5   : > { %2835 = vmatpush1.bf16.msra.mxu1 %v3616_v59  ;;  %v3009_v59 = vld [vmem:[#allocation5 + $0xa0] ss:$8 sps:$4 sm:$0xff]  }
 0x1f6   : > { %2837 = vmatprep.subr.bf16.mxu1 %v3619_v62  ;;  %1140 = vmatpush1.bf16.msra.mxu0 %v3009_v59  ;;  %v3014_v62 = vld [vmem:[#allocation5 + $0xb4] ss:$8 sps:$4 sm:$0xff]  }
 0x1f7   : > { %1141 = vmatprep.subr.bf16.mxu0 %v3014_v62 }
 0x1f9   : > { %2839 = vmatpush1.bf16.msra.mxu1 %v3622_v3  ;;  %v3012_v3 = vld [vmem:[#allocation5 + $0xb0] ss:$8 sps:$4 sm:$0xff]  }
 0x1fa   : > { %2841 = vmatprep.subr.bf16.mxu1 %v3625_v6  ;;  %1142 = vmatpush1.bf16.msra.mxu0 %v3012_v3  ;;  %v3017_v6 = vld [vmem:[#allocation5 + $0xc4] ss:$8 sps:$4 sm:$0xff]  }
 0x1fb   : > { %1143 = vmatprep.subr.bf16.mxu0 %v3017_v6 }
 0x1fd   : > { %2843 = vmatpush1.bf16.msra.mxu1 %v3628_v9  ;;  %v3015_v9 = vld [vmem:[#allocation5 + $0xc0] ss:$8 sps:$4 sm:$0xff]  }
 0x1fe   : > { %2845 = vmatprep.subr.bf16.mxu1 %v3631_v12  ;;  %1144 = vmatpush1.bf16.msra.mxu0 %v3015_v9  ;;  %v3020_v12 = vld [vmem:[#allocation5 + $0xd4] ss:$8 sps:$4 sm:$0xff]  }
 0x1ff   : > { %1145 = vmatprep.subr.bf16.mxu0 %v3020_v12 }
 0x201   : > { %2847 = vmatpush1.bf16.msra.mxu1 %v3634_v17  ;;  %v3018_v17 = vld [vmem:[#allocation5 + $0xd0] ss:$8 sps:$4 sm:$0xff]  }
 0x202   : > { %2849 = vmatprep.subr.bf16.mxu1 %v3637_v19  ;;  %1146 = vmatpush1.bf16.msra.mxu0 %v3018_v17  ;;  %v3023_v19 = vld [vmem:[#allocation5 + $0xe4] ss:$8 sps:$4 sm:$0xff]  }
 0x203   : > { %1147 = vmatprep.subr.bf16.mxu0 %v3023_v19 }
 0x205   : > { %2851 = vmatpush1.bf16.msra.mxu1 %v3640_v20  ;;  %v3021_v20 = vld [vmem:[#allocation5 + $0xe0] ss:$8 sps:$4 sm:$0xff]  }
 0x206   : > { %2853 = vmatprep.subr.bf16.mxu1 %v3649_v41  ;;  %1148 = vmatpush1.bf16.msra.mxu0 %v3021_v20  ;;  %v3024_v41 = vld [vmem:[#allocation5 + $0xf0] ss:$8 sps:$4 sm:$0xff]  }
 0x207   : > { %v3146_v20 = vld [vmem:[#allocation7 + $0x98] sm:$0xff]  }
 0x209   : > { %2855 = vmatpush1.bf16.msra.mxu1 %v3651_v44  ;;  %v3026_v44 = vld [vmem:[#allocation5 + $0xf4] ss:$8 sps:$4 sm:$0xff]  }
 0x20a   : > { %2857 = vmatprep.subr.bf16.mxu1 %v3655_v15  ;;  %1149 = vmatprep.subr.bf16.mxu0 %v3026_v44  ;;  %v3029_v15 = vld [vmem:[#allocation5 + $0x104] ss:$8 sps:$4 sm:$0xff]  }
 0x20b   : > { %1150 = vmatpush1.bf16.msra.mxu0 %v3024_v41 }
 0x20c   : > { %1322 = vmatprep.subr.bf16.mxu0 %v3029_v15 }
 0x20d   : > { %2859 = vmatpush1.bf16.msra.mxu1 %v3657_v50 }
 0x20e   : > { %2861 = vmatprep.subr.bf16.mxu1 %v3661_v54 }
 0x211   : > { %2863 = vmatpush1.bf16.msra.mxu1 %v3663_v58 }
 0x212   : > { %2865 = vmatprep.subr.bf16.mxu1 %v3667_v63 }
 0x215   : > { %2867 = vmatpush1.bf16.msra.mxu1 %v3669_v5 }
 0x216   : > { %2869 = vmatprep.subr.bf16.mxu1 %v3672_v11 }
 0x219   : > { %2871 = vmatpush1.bf16.msra.mxu1 %v3675_v22 }
 0x21a   : > { %2873 = vmatprep.subr.bf16.mxu1 %v3678_v24 }
 0x21d   : > { %2875 = vmatpush1.bf16.msra.mxu1 %v3681_v27 }
 0x2b3   : > { %v759_v50 = vpop.f32.mrb[0].mxu1 }
 0x2b4   : > { %v764_v54 = vmul.f32 %v759_v50, %v759_v50  ;;  %v761_v58 = vpop.f32.mrb[1].mxu1 }
 0x2b5   : > { %v765_v63 = vmul.f32 %v761_v58, %v761_v58 }
 0x2b6   : > { %v768_v5 = vrot.slane %v764_v54, 7 }
 0x2b7   : > { %v769_v11 = vrot.slane %v765_v63, 7 }
 0x2b8   : > { %v772_v22 = vsub.f32 %v759_v50, %v768_v5  ;;  %v3032_v5 = vld [vmem:[#allocation5 + $0x114] ss:$8 sps:$4 sm:$0xff]  }
 0x2b9   : > { %v773_v24 = vsub.f32 %v761_v58, %v769_v11 }
 0x2ba   : > { %v774_v27 = vadd.f32 1e-05, %v772_v22 }
 0x2bb   : > { %v775_v4 = vadd.f32 1e-05, %v773_v24 }
 0x2bc   : > { %3171 = vrsqrt.f32 %v774_v27 }
 0x2bd   : > { %3173 = vrsqrt.f32 %v775_v4  ;;  %v3030_v4 = vld [vmem:[#allocation5 + $0x110] ss:$8 sps:$4 sm:$0xff]  }
 0x2c6   : > { %v3172_v35 = vpop.eup %3171 }
 0x2c7   : > { %v3174_v36 = vpop.eup %3173  ;;  %v789_v37 = vmul.f32 %v3172_v35, %v782_v28  ;;  %v3035_v28 = vld [vmem:[#allocation5 + $0x124] ss:$8 sps:$4 sm:$0xff]  }
 0x2c8   : > { %v790_v38 = vmul.f32 %v3174_v36, %v786_v30  ;;  %v3033_v30 = vld [vmem:[#allocation5 + $0x120] ss:$8 sps:$4 sm:$0xff]   ;;  %v3041_v35 = vld [vmem:[#allocation5 + $0x144] ss:$8 sps:$4 sm:$0xff]  }
 0x2c9   : > { %v793_v43 = vrot.slane %v789_v37, 1  ;;  %v821_v0 = vrot.slane %v789_v37, %v3690_v16  ;;  %v3039_v36 = vld [vmem:[#allocation5 + $0x140] ss:$8 sps:$4 sm:$0xff]   ;;  %v3044_v37 = vld [vmem:[#allocation5 + $0x154] ss:$8 sps:$4 sm:$0xff]  }
 0x2ca   : > { %v794_v46 = vrot.slane %v790_v38, 1  ;;  %v825_v13 = vrot.slane %v790_v38, %v3690_v16  ;;  %v3042_v38 = vld [vmem:[#allocation5 + $0x150] ss:$8 sps:$4 sm:$0xff]  }
 0x2cb   : > { %v797_v48 = vmul.f32 %v793_v43, %v759_v50  ;;  %v826_v21 = vmul.f32 %v821_v0, %v3697_v52  ;;  %v828_v14 = vmul.f32 %v821_v0, %v3701_v61  ;;  %v3027_v50 = vld [vmem:[#allocation5 + $0x100] ss:$8 sps:$4 sm:$0xff]   ;;  %v3054_v0 = vld [vmem:[#allocation5 + $0x190] ss:$8 sps:$4 sm:$0xff]  }
 0x2cc   : > { %v798_v49 = vmul.f32 %v794_v46, %v761_v58  ;;  %v827_v25 = vmul.f32 %v825_v13, %v3699_v57  ;;  %v829_v23 = vmul.f32 %v825_v13, %v4004_v2  ;;  %v3045_v43 = vld [vmem:[#allocation5 + $0x160] ss:$8 sps:$4 sm:$0xff]   ;;  %v3050_v46 = vld [vmem:[#allocation5 + $0x174] ss:$8 sps:$4 sm:$0xff]   ;;  %v3066_v2 = vld [vmem:[#allocation5 + $0x1d0] ss:$8 sps:$4 sm:$0xff]  }
 0x2cd   : > { %v3062_v13 = vld [vmem:[#allocation5 + $0x1b4] ss:$8 sps:$4 sm:$0xff]  }
 0x2ce   : > { %v801_v55 = vcombine.low %v797_v48, %v798_v49  ;;  %v3048_v48 = vld [vmem:[#allocation5 + $0x170] ss:$8 sps:$4 sm:$0xff]   ;;  %v3053_v49 = vld [vmem:[#allocation5 + $0x184] ss:$8 sps:$4 sm:$0xff]  }
 0x2d0   : > { %v808_v60 = vrot.slane %v801_v55, %v3756_v51  ;;  %v3051_v55 = vld [vmem:[#allocation5 + $0x180] ss:$8 sps:$4 sm:$0xff]  }
 0x2d2   : > { %v815_v10 = vrot.slane %v808_v60, %v3756_v51  ;;  %v3056_v60 = vld [vmem:[#allocation5 + $0x194] ss:$8 sps:$4 sm:$0xff]  }
 0x2d4   : > { %v817_v8 = vsub.f32 %v658_v7, %v815_v10  ;;  %v3059_v7 = vld [vmem:[#allocation5 + $0x1a4] ss:$8 sps:$4 sm:$0xff]   ;;  %v3057_v10 = vld [vmem:[#allocation5 + $0x1a0] ss:$8 sps:$4 sm:$0xff]  }
 0x2d6   : > { %v834_v29 = vrot.slane %v817_v8, %v3687_v18  ;;  %v838_v33 = vrot.slane %v817_v8, %v3690_v16  ;;  %v3060_v8 = vld [vmem:[#allocation5 + $0x1b0] ss:$8 sps:$4 sm:$0xff]  }
 0x2d8   : > { %v841_v34 = vadd.f32 %v834_v29, %v826_v21  ;;  %v842_v39 = vadd.f32 %v838_v33, %v827_v25  ;;  %v843_v40 = vadd.f32 %v834_v29, %v828_v14  ;;  %v844_v45 = vadd.f32 %v838_v33, %v829_v23  ;;  %v3065_v21 = vld [vmem:[#allocation5 + $0x1c4] ss:$8 sps:$4 sm:$0xff]   ;;  %v3063_v14 = vld [vmem:[#allocation5 + $0x1c0] ss:$8 sps:$4 sm:$0xff]   ;;  %v3068_v25 = vld [vmem:[#allocation5 + $0x1d4] ss:$8 sps:$4 sm:$0xff]  }
 0x2d9   : > { %v3071_v23 = vld [vmem:[#allocation5 + $0x1e4] ss:$8 sps:$4 sm:$0xff]   ;;  %v3069_v29 = vld [vmem:[#allocation5 + $0x1e0] ss:$8 sps:$4 sm:$0xff]   ;;  %v3074_v33 = vld [vmem:[#allocation5 + $0x1f4] ss:$8 sps:$4 sm:$0xff]  }
 0x2da   : > { %v3771_v47 = vmax.f32 %v841_v34, 0.0  ;;  %v846_v53 = vmax.f32 %v842_v39, 0.0  ;;  %v3773_v56 = vmax.f32 %v843_v40, 0.0  ;;  %v848_v52 = vmax.f32 %v844_v45, 0.0  ;;  %v3072_v34 = vld [vmem:[#allocation5 + $0x1f0] ss:$8 sps:$4 sm:$0xff]  }
 0x2db   : > { %v3077_v39 = vld [vmem:[#allocation5 + $0x204] ss:$8 sps:$4 sm:$0xff]   ;;  %v3075_v40 = vld [vmem:[#allocation5 + $0x200] ss:$8 sps:$4 sm:$0xff]  }
 0x2dc   : > { %v853_v59 = vrot.slane %v848_v52, 7  ;;  %v859_v61 = vrot.slane %v846_v53, 7  ;;  %v852_v57 = vrot.slane %v3773_v56, 7  ;;  %v858_v62 = vrot.slane %v3771_v47, 7 }
 0x2dd   : > { %v891_v3 = vpack.c.bf16 %v848_v52, %v846_v53  ;;  %v890_v6 = vpack.c.bf16 %v3773_v56, %v3771_v47  ;;  %v875_v9 = vrot.slane %v846_v53, 1  ;;  %v876_v12 = vrot.slane %v848_v52, 1  ;;  %v3080_v52 = vld [vmem:[#allocation5 + $0x214] ss:$8 sps:$4 sm:$0xff]  }
 0x2de   : > { %v861_v17 = vsel %vm532_vm2, %v859_v61, %v853_v59  ;;  %v867_v19 = vsel %vm532_vm2, %v853_v59, %v859_v61  ;;  %v860_v41 = vsel %vm532_vm2, %v858_v62, %v852_v57  ;;  %v866_v44 = vsel %vm532_vm2, %v852_v57, %v858_v62  ;;  %v3078_v59 = vld [vmem:[#allocation5 + $0x210] ss:$8 sps:$4 sm:$0xff]   ;;  %v3083_v61 = vld [vmem:[#allocation5 + $0x224] ss:$8 sps:$4 sm:$0xff]   ;;  %v3081_v57 = vld [vmem:[#allocation5 + $0x220] ss:$8 sps:$4 sm:$0xff]  }
 0x2df   : > { %v2539_v15 = vpack.c.bf16 %v861_v17, %v867_v19  ;;  %v2542_v54 = vpack.c.bf16 %v860_v41, %v866_v44  ;;  %v3791_v58 = vsel %vm546_vm0, %v875_v9, %v876_v12  ;;  %v3794_v63 = vsel %vm546_vm0, %v876_v12, %v875_v9  ;;  %v3086_v62 = vld [vmem:[#allocation5 + $0x234] ss:$8 sps:$4 sm:$0xff]   ;;  %v3089_v9 = vld [vmem:[#allocation5 + $0x244] ss:$8 sps:$4 sm:$0xff]   ;;  %v3093_v17 = vld [vmem:[#allocation5 + $0x260] ss:$8 sps:$4 sm:$0xff]  }
 0x2e0   : > { %v2609_v1 = vpack.c.bf16 %v3794_v63, %v3791_v58  ;;  %v872_v11 = vrot.slane %v3771_v47, 1  ;;  %v873_v22 = vrot.slane %v3773_v56, 1  ;;  %v3087_v47 = vld [vmem:[#allocation5 + $0x240] ss:$8 sps:$4 sm:$0xff]   ;;  %v3092_v56 = vld [vmem:[#allocation5 + $0x254] ss:$8 sps:$4 sm:$0xff]  }
 0x2e1   : > { %2540 = vmatprep.mubr.msk.bf16.mxu0 %vm3784_vm9, %v2539_v15  ;;  %v3095_v12 = vld [vmem:[#allocation5 + $0x264] ss:$8 sps:$4 sm:$0xff]   ;;  %v3098_v19 = vld [vmem:[#allocation5 + $0x274] ss:$8 sps:$4 sm:$0xff]   ;;  %v3096_v41 = vld [vmem:[#allocation5 + $0x270] ss:$8 sps:$4 sm:$0xff]  }
 0x2e2   : > { %2543 = vmatmul.mubr.msk.bf16.vlgmr.msra.gmra.mrb[4].mxu0 %vm3784_vm9, %v2542_v54  ;;  %v3805_v24 = vsel %vm546_vm0, %v872_v11, %v873_v22  ;;  %v3808_v27 = vsel %vm546_vm0, %v873_v22, %v872_v11  ;;  %v3101_v44 = vld [vmem:[#allocation5 + $0x284] ss:$8 sps:$4 sm:$0xff]   ;;  %v3099_v15 = vld [vmem:[#allocation5 + $0x280] ss:$8 sps:$4 sm:$0xff]   ;;  %v3102_v54 = vld [vmem:[#allocation5 + $0x290] ss:$8 sps:$4 sm:$0xff]  }
 0x2e3   : > { %1323 = vmatpush1.bf16.msra.mxu0 %v3027_v50  ;;  %1354 = vmatprep.mubr.bf16.mxu0 %v891_v3  ;;  %v2612_v26 = vpack.c.bf16 %v3808_v27, %v3805_v24  ;;  %v3084_v3 = vld [vmem:[#allocation5 + $0x230] ss:$8 sps:$4 sm:$0xff]   ;;  %v3104_v50 = vld [vmem:[#allocation5 + $0x294] ss:$8 sps:$4 sm:$0xff]   ;;  %v3107_v58 = vld [vmem:[#allocation5 + $0x2a4] ss:$8 sps:$4 sm:$0xff]  }
 0x2e4   : > { %1324 = vmatprep.subr.bf16.mxu0 %v3032_v5  ;;  %v3105_v63 = vld [vmem:[#allocation5 + $0x2a0] ss:$8 sps:$4 sm:$0xff]   ;;  %v3110_v5 = vld [vmem:[#allocation5 + $0x2b4] ss:$8 sps:$4 sm:$0xff]   ;;  %v3113_v11 = vld [vmem:[#allocation5 + $0x2c4] ss:$8 sps:$4 sm:$0xff]  }
 0x2e5   : > { %v3111_v22 = vld [vmem:[#allocation5 + $0x2c0] ss:$8 sps:$4 sm:$0xff]  }
 0x2e7   : > { %1325 = vmatpush1.bf16.msra.mxu0 %v3030_v4  ;;  %v3116_v4 = vld [vmem:[#allocation5 + $0x2d4] ss:$8 sps:$4 sm:$0xff]  }
 0x2e8   : > { %1326 = vmatprep.subr.bf16.mxu0 %v3035_v28  ;;  %v3114_v28 = vld [vmem:[#allocation5 + $0x2d0] ss:$8 sps:$4 sm:$0xff]  }
 0x2eb   : > { %1327 = vmatpush1.bf16.msra.mxu0 %v3033_v30  ;;  %v3119_v30 = vld [vmem:[#allocation5 + $0x2e4] ss:$8 sps:$4 sm:$0xff]  }
 0x2ec   : > { %1328 = vmatprep.subr.bf16.mxu0 %v3038_v31  ;;  %v3117_v31 = vld [vmem:[#allocation5 + $0x2e0] ss:$8 sps:$4 sm:$0xff]  }
 0x2ef   : > { %1329 = vmatpush1.bf16.msra.mxu0 %v3036_v32  ;;  %v3122_v32 = vld [vmem:[#allocation5 + $0x2f4] ss:$8 sps:$4 sm:$0xff]  }
 0x2f0   : > { %1330 = vmatprep.subr.bf16.mxu0 %v3041_v35  ;;  %v3120_v35 = vld [vmem:[#allocation5 + $0x2f0] ss:$8 sps:$4 sm:$0xff]  }
 0x2f3   : > { %1331 = vmatpush1.bf16.msra.mxu0 %v3039_v36  ;;  %v849_v36 = vld [vmem:[%s3965_s7] sm:$0x3] }
 0x2f4   : > { %1332 = vmatprep.subr.bf16.mxu0 %v3044_v37  ;;  %v1611_v37 = vrot.slane %v849_v36, %v3687_v18 }
 0x2f7   : > { %1333 = vmatpush1.bf16.msra.mxu0 %v3042_v38  ;;  %v1615_v38 = vrot.slane %v849_v36, %v3690_v16  ;;  %v3137_v36 = vld [vmem:[#allocation7 + $0x78] sm:$0xff]  }
 0x2f8   : > { %1334 = vmatprep.subr.bf16.mxu0 %v3047_v42 }
 0x2fb   : > { %1335 = vmatpush1.bf16.msra.mxu0 %v3045_v43 }
 0x2fc   : > { %1336 = vmatprep.subr.bf16.mxu0 %v3050_v46 }
 0x2ff   : > { %1337 = vmatpush1.bf16.msra.mxu0 %v3048_v48 }
 0x300   : > { %1338 = vmatprep.subr.bf16.mxu0 %v3053_v49 }
 0x303   : > { %1339 = vmatpush1.bf16.msra.mxu0 %v3051_v55 }
 0x304   : > { %1340 = vmatprep.subr.bf16.mxu0 %v3056_v60 }
 0x307   : > { %1341 = vmatpush1.bf16.msra.mxu0 %v3054_v0 }
 0x308   : > { %1342 = vmatprep.subr.bf16.mxu0 %v3059_v7 }
 0x30b   : > { %1343 = vmatpush1.bf16.msra.mxu0 %v3057_v10 }
 0x30c   : > { %1344 = vmatprep.subr.bf16.mxu0 %v3062_v13 }
 0x30f   : > { %1345 = vmatpush1.bf16.msra.mxu0 %v3060_v8 }
 0x310   : > { %1346 = vmatprep.subr.bf16.mxu0 %v3065_v21 }
 0x313   : > { %1347 = vmatpush1.bf16.msra.mxu0 %v3063_v14 }
 0x314   : > { %1348 = vmatprep.subr.bf16.mxu0 %v3068_v25 }
 0x317   : > { %1349 = vmatpush1.bf16.msra.mxu0 %v3066_v2 }
 0x318   : > { %1350 = vmatprep.subr.bf16.mxu0 %v3071_v23 }
 0x31b   : > { %1351 = vmatpush1.bf16.msra.mxu0 %v3069_v29 }
 0x31c   : > { %1352 = vmatprep.subr.bf16.mxu0 %v3074_v33 }
 0x31f   : > { %1353 = vmatpush1.bf16.msra.mxu0 %v3072_v34 }
 0x320   : > { %1560 = vmatprep.subr.bf16.mxu0 %v3077_v39 }
 0x322   : > { %1355 = vmatmul.mubr.bf16.vlgmr.msra.gmra.mrb[4].mxu0 %v890_v6  ;;  %v3090_v6 = vld [vmem:[#allocation5 + $0x250] ss:$8 sps:$4 sm:$0xff]  }
 0x323   : > { %1561 = vmatpush1.bf16.msra.mxu0 %v3075_v40  ;;  %2610 = vmatprep.mubr.msk.bf16.mxu0 %vm3815_vm10, %v2609_v1  ;;  %v3108_v1 = vld [vmem:[#allocation5 + $0x2b0] ss:$8 sps:$4 sm:$0xff]  }
 0x324   : > { %1562 = vmatprep.subr.bf16.mxu0 %v3080_v52 }
 0x327   : > { %1563 = vmatpush1.bf16.msra.mxu0 %v3078_v59 }
 0x328   : > { %1564 = vmatprep.subr.bf16.mxu0 %v3083_v61 }
 0x32b   : > { %1565 = vmatpush1.bf16.msra.mxu0 %v3081_v57 }
 0x32c   : > { %1566 = vmatprep.subr.bf16.mxu0 %v3086_v62 }
 0x32f   : > { %1567 = vmatpush1.bf16.msra.mxu0 %v3084_v3 }
 0x330   : > { %1568 = vmatprep.subr.bf16.mxu0 %v3089_v9 }
 0x333   : > { %1569 = vmatpush1.bf16.msra.mxu0 %v3087_v47 }
 0x334   : > { %1570 = vmatprep.subr.bf16.mxu0 %v3092_v56 }
 0x337   : > { %1571 = vmatpush1.bf16.msra.mxu0 %v3090_v6 }
 0x338   : > { %1572 = vmatprep.subr.bf16.mxu0 %v3095_v12 }
 0x33b   : > { %1573 = vmatpush1.bf16.msra.mxu0 %v3093_v17 }
 0x33c   : > { %1574 = vmatprep.subr.bf16.mxu0 %v3098_v19 }
 0x33f   : > { %1575 = vmatpush1.bf16.msra.mxu0 %v3096_v41 }
 0x340   : > { %1576 = vmatprep.subr.bf16.mxu0 %v3101_v44 }
 0x343   : > { %1577 = vmatpush1.bf16.msra.mxu0 %v3099_v15 }
 0x344   : > { %1578 = vmatprep.subr.bf16.mxu0 %v3104_v50  ;;  %v3123_v50 = vld [vmem:[#allocation7 + $0x40] sm:$0xff]  }
 0x345   : > { %2682 = vmatprep.subr.bf16.mxu1 %v3123_v50 }
 0x347   : > { %1579 = vmatpush1.bf16.msra.mxu0 %v3102_v54  ;;  %v3124_v54 = vld [vmem:[#allocation7] sm:$0xff]  }
 0x348   : > { %1580 = vmatprep.subr.bf16.mxu0 %v3107_v58  ;;  %v3125_v58 = vld [vmem:[#allocation7 + $0x48] sm:$0xff]  }
 0x34b   : > { %1581 = vmatpush1.bf16.msra.mxu0 %v3105_v63  ;;  %v3126_v63 = vld [vmem:[#allocation7 + $0x8] sm:$0xff]  }
 0x34c   : > { %1582 = vmatprep.subr.bf16.mxu0 %v3110_v5  ;;  %v3127_v5 = vld [vmem:[#allocation7 + $0x50] sm:$0xff]  }
 0x34f   : > { %1583 = vmatpush1.bf16.msra.mxu0 %v3108_v1  ;;  %v3128_v1 = vld [vmem:[#allocation7 + $0x10] sm:$0xff]  }
 0x350   : > { %1584 = vmatprep.subr.bf16.mxu0 %v3113_v11  ;;  %v3129_v11 = vld [vmem:[#allocation7 + $0x58] sm:$0xff]  }
 0x353   : > { %1585 = vmatpush1.bf16.msra.mxu0 %v3111_v22  ;;  %v3130_v22 = vld [vmem:[#allocation7 + $0x18] sm:$0xff]  }
 0x354   : > { %1586 = vmatprep.subr.bf16.mxu0 %v3116_v4  ;;  %v3131_v4 = vld [vmem:[#allocation7 + $0x60] sm:$0xff]  }
 0x357   : > { %1587 = vmatpush1.bf16.msra.mxu0 %v3114_v28  ;;  %v3132_v28 = vld [vmem:[#allocation7 + $0x20] sm:$0xff]  }
 0x358   : > { %1588 = vmatprep.subr.bf16.mxu0 %v3119_v30  ;;  %v3133_v30 = vld [vmem:[#allocation7 + $0x68] sm:$0xff]  }
 0x35b   : > { %1589 = vmatpush1.bf16.msra.mxu0 %v3117_v31  ;;  %v3134_v31 = vld [vmem:[#allocation7 + $0x28] sm:$0xff]  }
 0x35c   : > { %1590 = vmatprep.subr.bf16.mxu0 %v3122_v32  ;;  %v3135_v32 = vld [vmem:[#allocation7 + $0x70] sm:$0xff]  }
 0x35f   : > { %1591 = vmatpush1.bf16.msra.mxu0 %v3120_v35  ;;  %v3136_v35 = vld [vmem:[#allocation7 + $0x30] sm:$0xff]  }
 0x362   : > { %2613 = vmatmul.mubr.msk.bf16.vlgmr.msra.gmra.mrb[4].mxu0 %vm3815_vm10, %v2612_v26 }
 0x435   : > { %v1594_v42 = vpop.f32.mrb[4].mxu0 }
 0x436   : > { %v3837_v43 = vadd.f32 %v1611_v37, %v1594_v42  ;;  %v1596_v46 = vpop.f32.mrb[5].mxu0 }
 0x437   : > { %v3839_v48 = vadd.f32 %v1615_v38, %v1596_v46  ;;  %v1598_v49 = vpop.f32.mrb[6].mxu0 }
 0x438   : > { %v3841_v55 = vadd.f32 %v1611_v37, %v1598_v49  ;;  %v1600_v24 = vpop.f32.mrb[7].mxu0  ;;  %v1638_v26 = vmul.f32 %v3837_v43, %v3837_v43  ;;  %v3138_v37 = vld [vmem:[#allocation7 + $0x38] sm:$0xff]  }
 0x439   : > { %v3843_v27 = vadd.f32 %v1615_v38, %v1600_v24  ;;  %v1639_v7 = vmul.f32 %v3839_v48, %v3839_v48  ;;  %v3139_v38 = vld [vmem:[#allocation7 + $0xc0] sm:$0xff]  }
 0x43a   : > { %v1624_v60 = vadd.f32 %v3841_v55, %v3837_v43  ;;  %v1640_v0 = vmul.f32 %v3841_v55, %v3841_v55 }
 0x43b   : > { %v1631_v10 = vadd.f32 %v3843_v27, %v3839_v48  ;;  %v1641_v13 = vmul.f32 %v3843_v27, %v3843_v27 }
 0x43c   : > { %v1625_v8 = vrot.slane %v1624_v60, 4  ;;  %v1642_v21 = vadd.f32 %v1640_v0, %v1638_v26 }
 0x43d   : > { %v1632_v14 = vrot.slane %v1631_v10, 4  ;;  %v1649_v25 = vadd.f32 %v1641_v13, %v1639_v7 }
 0x43e   : > { %v1626_v2 = vadd.f32 %v1625_v8, %v1624_v60  ;;  %v1643_v23 = vrot.slane %v1642_v21, 4  ;;  %v1622_v8 = vld [vmem:[%s3966_s8] sm:$0x3] }
 0x43f   : > { %v1633_v29 = vadd.f32 %v1632_v14, %v1631_v10  ;;  %v1650_v33 = vrot.slane %v1649_v25, 4  ;;  %v1751_v14 = vrot.slane %v1622_v8, %v3690_v16 }
 0x440   : > { %v1627_v34 = vrot.slane %v1626_v2, 2  ;;  %v1644_v39 = vadd.f32 %v1643_v23, %v1642_v21  ;;  %v1747_v21 = vrot.slane %v1622_v8, %v3687_v18  ;;  %v3149_v8 = vld [vmem:[#allocation7 + $0xe8] sm:$0xff]  }
 0x441   : > { %v1634_v40 = vrot.slane %v1633_v29, 2  ;;  %v1651_v45 = vadd.f32 %v1650_v33, %v1649_v25 }
 0x442   : > { %v1628_v52 = vadd.f32 %v1627_v34, %v1626_v2  ;;  %v1645_v59 = vrot.slane %v1644_v39, 2 }
 0x443   : > { %v1635_v61 = vadd.f32 %v1634_v40, %v1633_v29  ;;  %v1652_v57 = vrot.slane %v1651_v45, 2 }
 0x444   : > { %v1646_v62 = vadd.f32 %v1645_v59, %v1644_v39  ;;  %v1629_v47 = vrot.slane %v1628_v52, 1 }
 0x445   : > { %v1636_v3 = vrot.slane %v1635_v61, 1  ;;  %v1653_v9 = vadd.f32 %v1652_v57, %v1651_v45 }
 0x446   : > { %v1647_v56 = vrot.slane %v1646_v62, 1  ;;  %v1630_v41 = vadd.f32 %v1629_v47, %v1628_v52 }
 0x447   : > { %v1654_v6 = vrot.slane %v1653_v9, 1  ;;  %v1637_v17 = vadd.f32 %v1636_v3, %v1635_v61  ;;  %v1623_v61 = vld [vmem:[%s3967_s9] sm:$0x3] }
 0x448   : > { %v1648_v12 = vadd.f32 %v1647_v56, %v1646_v62 }
 0x449   : > { %v1655_v19 = vadd.f32 %v1654_v6, %v1653_v9 }
 0x44a   : > { %v1656_v15 = vsel %vm532_vm2, %v1630_v41, %v1648_v12 }
 0x44b   : > { %v1657_v44 = vsel %vm532_vm2, %v1637_v17, %v1655_v19 }
 0x44c   : > { %1722 = vmatprep.mubr.f32.mxu1 %v1657_v44 }
 0x44d   : > { %1723 = vmatmul.mubr.f32.vlgmr.msra.gmra.mrb[2].mxu1 %v1656_v15 }
 0x44e   : > { %2683 = vmatpush3.bf16.msra.mxu1 %v3124_v54 }
 0x44f   : > { %2684 = vmatprep.subr.bf16.mxu1 %v3125_v58 }
 0x452   : > { %2685 = vmatpush3.bf16.msra.mxu1 %v3126_v63 }
 0x453   : > { %2686 = vmatprep.subr.bf16.mxu1 %v3127_v5 }
 0x456   : > { %2687 = vmatpush3.bf16.msra.mxu1 %v3128_v1 }
 0x457   : > { %2688 = vmatprep.subr.bf16.mxu1 %v3129_v11 }
 0x45a   : > { %2689 = vmatpush3.bf16.msra.mxu1 %v3130_v22 }
 0x45b   : > { %2690 = vmatprep.subr.bf16.mxu1 %v3131_v4 }
 0x45e   : > { %2691 = vmatpush3.bf16.msra.mxu1 %v3132_v28 }
 0x45f   : > { %2692 = vmatprep.subr.bf16.mxu1 %v3133_v30 }
 0x462   : > { %2693 = vmatpush3.bf16.msra.mxu1 %v3134_v31  ;;  %v3140_v31 = vld [vmem:[#allocation7 + $0x80] sm:$0xff]  }
 0x463   : > { %2694 = vmatprep.subr.bf16.mxu1 %v3135_v32 }
 0x466   : > { %2695 = vmatpush3.bf16.msra.mxu1 %v3136_v35 }
 0x467   : > { %2696 = vmatprep.subr.bf16.mxu1 %v3137_v36  ;;  %v3141_v36 = vld [vmem:[#allocation7 + $0xc8] sm:$0xff]  }
 0x46a   : > { %2697 = vmatpush3.bf16.msra.mxu1 %v3138_v37 }
 0x46b   : > { %2704 = vmatprep.subr.bf16.mxu1 %v3139_v38 }
 0x520   : > { %v1724_v42 = vpop.f32.mrb[2].mxu1 }
 0x521   : > { %v1729_v46 = vmul.f32 %v1724_v42, %v1724_v42  ;;  %v1726_v49 = vpop.f32.mrb[3].mxu1 }
 0x522   : > { %v1730_v24 = vmul.f32 %v1726_v49, %v1726_v49 }
 0x523   : > { %v1733_v26 = vrot.slane %v1729_v46, 7 }
 0x524   : > { %v1734_v60 = vrot.slane %v1730_v24, 7  ;;  %v3142_v24 = vld [vmem:[#allocation7 + $0x88] sm:$0xff]  }
 0x525   : > { %v1737_v0 = vsub.f32 %v1724_v42, %v1733_v26 }
 0x526   : > { %v1738_v7 = vsub.f32 %v1726_v49, %v1734_v60  ;;  %v3143_v60 = vld [vmem:[#allocation7 + $0xd0] sm:$0xff]  }
 0x527   : > { %v1739_v10 = vadd.f32 1e-05, %v1737_v0  ;;  %v3144_v0 = vld [vmem:[#allocation7 + $0x90] sm:$0xff]  }
 0x528   : > { %v1740_v13 = vadd.f32 1e-05, %v1738_v7  ;;  %v3145_v7 = vld [vmem:[#allocation7 + $0xd8] sm:$0xff]  }
 0x529   : > { %3175 = vrsqrt.f32 %v1739_v10  ;;  %v3147_v10 = vld [vmem:[#allocation7 + $0xe0] sm:$0xff]  }
 0x52a   : > { %3177 = vrsqrt.f32 %v1740_v13  ;;  %v3148_v13 = vld [vmem:[#allocation7 + $0xa0] sm:$0xff]  }
 0x533   : > { %v3176_v25 = vpop.eup %3175 }
 0x534   : > { %v3178_v2 = vpop.eup %3177  ;;  %v1754_v23 = vmul.f32 %v3176_v25, %v1747_v21  ;;  %v3150_v21 = vld [vmem:[#allocation7 + $0xa8] sm:$0xff]   ;;  %v3152_v25 = vld [vmem:[#allocation7 + $0xb0] sm:$0xff]  }
 0x535   : > { %v1755_v29 = vmul.f32 %v3178_v2, %v1751_v14  ;;  %v3151_v14 = vld [vmem:[#allocation7 + $0xf0] sm:$0xff]   ;;  %v3153_v2 = vld [vmem:[#allocation7 + $0xf8] sm:$0xff]  }
 0x536   : > { %v1758_v33 = vrot.slane %v1754_v23, 1  ;;  %v1786_v59 = vrot.slane %v1754_v23, %v3690_v16  ;;  %v3154_v23 = vld [vmem:[#allocation7 + $0xb8] sm:$0xff]  }
 0x537   : > { %v1759_v34 = vrot.slane %v1755_v29, 1  ;;  %v1790_v62 = vrot.slane %v1755_v29, %v3690_v16  ;;  %v3155_v29 = vld [vmem:[#allocation7 + $0x140] sm:$0xff]  }
 0x538   : > { %v1762_v39 = vmul.f32 %v1758_v33, %v1724_v42  ;;  %v1791_v9 = vmul.f32 %v1786_v59, %v3837_v43  ;;  %v1793_v47 = vmul.f32 %v1786_v59, %v3841_v55  ;;  %v3156_v33 = vld [vmem:[#allocation7 + $0x100] sm:$0xff]   ;;  %v3162_v59 = vld [vmem:[#allocation7 + $0x118] sm:$0xff]  }
 0x539   : > { %v1763_v40 = vmul.f32 %v1759_v34, %v1726_v49  ;;  %v1792_v56 = vmul.f32 %v1790_v62, %v3839_v48  ;;  %v1794_v6 = vmul.f32 %v1790_v62, %v3843_v27  ;;  %v3157_v34 = vld [vmem:[#allocation7 + $0x148] sm:$0xff]  }
 0x53a   : > { %v3165_v62 = vld [vmem:[#allocation7 + $0x168] sm:$0xff]  }
 0x53b   : > { %v1766_v45 = vcombine.low %v1762_v39, %v1763_v40  ;;  %v3158_v39 = vld [vmem:[#allocation7 + $0x108] sm:$0xff]   ;;  %v3159_v40 = vld [vmem:[#allocation7 + $0x150] sm:$0xff]  }
 0x53d   : > { %v1773_v52 = vrot.slane %v1766_v45, %v3756_v51  ;;  %v3160_v45 = vld [vmem:[#allocation7 + $0x110] sm:$0xff]  }
 0x53f   : > { %v1780_v57 = vrot.slane %v1773_v52, %v3756_v51  ;;  %v3161_v52 = vld [vmem:[#allocation7 + $0x158] sm:$0xff]  }
 0x541   : > { %v1782_v3 = vsub.f32 %v1623_v61, %v1780_v57  ;;  %v3163_v61 = vld [vmem:[#allocation7 + $0x160] sm:$0xff]  }
 0x542   : > { %v3164_v57 = vld [vmem:[#allocation7 + $0x120] sm:$0xff]  }
 0x543   : > { %v1799_v12 = vrot.slane %v1782_v3, %v3687_v18  ;;  %v1803_v17 = vrot.slane %v1782_v3, %v3690_v16  ;;  %v3166_v3 = vld [vmem:[#allocation7 + $0x128] sm:$0xff]  }
 0x545   : > { %v1806_v19 = vadd.f32 %v1799_v12, %v1791_v9  ;;  %v1807_v41 = vadd.f32 %v1803_v17, %v1792_v56  ;;  %v1808_v44 = vadd.f32 %v1799_v12, %v1793_v47  ;;  %v1809_v15 = vadd.f32 %v1803_v17, %v1794_v6  ;;  %v3167_v9 = vld [vmem:[#allocation7 + $0x170] sm:$0xff]   ;;  %v3169_v56 = vld [vmem:[#allocation7 + $0x178] sm:$0xff]  }
 0x546   : > { %v3168_v47 = vld [vmem:[#allocation7 + $0x130] sm:$0xff]   ;;  %v3170_v6 = vld [vmem:[#allocation7 + $0x138] sm:$0xff]  }
 0x547   : > { %v3877_v51 = vmax.f32 %v1806_v19, 0.0  ;;  %v1811_v50 = vmax.f32 %v1807_v41, 0.0  ;;  %v1812_v54 = vmax.f32 %v1808_v44, 0.0  ;;  %v1813_v58 = vmax.f32 %v1809_v15, 0.0 }
 0x549   : > { %v1818_v43 = vrot.slane %v1813_v58, 7  ;;  %v1824_v63 = vrot.slane %v1811_v50, 7  ;;  %v1817_v55 = vrot.slane %v1812_v54, 7  ;;  %v1823_v48 = vrot.slane %v3877_v51, 7 }
 0x54a   : > { %v1856_v5 = vpack.c.bf16 %v1813_v58, %v1811_v50  ;;  %v1855_v27 = vpack.c.bf16 %v1812_v54, %v3877_v51  ;;  %v1840_v18 = vrot.slane %v1811_v50, 1  ;;  %v1841_v1 = vrot.slane %v1813_v58, 1 }
 0x54b   : > { %v1826_v16 = vsel %vm532_vm2, %v1824_v63, %v1818_v43  ;;  %v1832_v11 = vsel %vm532_vm2, %v1818_v43, %v1824_v63  ;;  %v1825_v22 = vsel %vm532_vm2, %v1823_v48, %v1817_v55  ;;  %v1831_v4 = vsel %vm532_vm2, %v1817_v55, %v1823_v48 }
 0x54c   : > { %v2631_v28 = vpack.c.bf16 %v1826_v16, %v1832_v11  ;;  %v2634_v30 = vpack.c.bf16 %v1825_v22, %v1831_v4  ;;  %v1842_v32 = vsel %vm546_vm0, %v1840_v18, %v1841_v1  ;;  %v1850_v35 = vsel %vm546_vm0, %v1841_v1, %v1840_v18  ;;  %v2674_v1 = vld [vmem:[%s3969_s11] ss:$0 sm:$0xff] }
 0x54d   : > { %v2669_v37 = vpack.c.bf16 %v1850_v35, %v1842_v32  ;;  %v1837_v38 = vrot.slane %v3877_v51, 1  ;;  %v1838_v42 = vrot.slane %v1812_v54, 1 }
 0x54e   : > { %2632 = vmatprep.mubr.msk.bf16.mxu1 %vm3784_vm9, %v2631_v28 }
 0x54f   : > { %2635 = vmatmul.mubr.msk.bf16.vlgmr.msra.gmra.mrb[4].mxu1 %vm3784_vm9, %v2634_v30  ;;  %v3893_v46 = vsel %vm546_vm0, %v1837_v38, %v1838_v42  ;;  %v3896_v49 = vsel %vm546_vm0, %v1838_v42, %v1837_v38 }
 0x550   : > { %2705 = vmatpush3.bf16.msra.mxu1 %v3140_v31  ;;  %2189 = vmatprep.mubr.bf16.mxu1 %v1856_v5  ;;  %v2672_v26 = vpack.c.bf16 %v3896_v49, %v3893_v46 }
 0x551   : > { %2706 = vmatprep.subr.bf16.mxu1 %v3141_v36 }
 0x554   : > { %2707 = vmatpush3.bf16.msra.mxu1 %v3142_v24 }
 0x555   : > { %2708 = vmatprep.subr.bf16.mxu1 %v3143_v60 }
 0x558   : > { %2709 = vmatpush3.bf16.msra.mxu1 %v3144_v0 }
 0x559   : > { %2710 = vmatprep.subr.bf16.mxu1 %v3145_v7 }
 0x55c   : > { %2711 = vmatpush3.bf16.msra.mxu1 %v3146_v20 }
 0x55d   : > { %2712 = vmatprep.subr.bf16.mxu1 %v3147_v10 }
 0x560   : > { %2713 = vmatpush3.bf16.msra.mxu1 %v3148_v13 }
 0x561   : > { %2714 = vmatprep.subr.bf16.mxu1 %v3149_v8 }
 0x564   : > { %2715 = vmatpush3.bf16.msra.mxu1 %v3150_v21 }
 0x565   : > { %2716 = vmatprep.subr.bf16.mxu1 %v3151_v14 }
 0x568   : > { %2717 = vmatpush3.bf16.msra.mxu1 %v3152_v25 }
 0x569   : > { %2718 = vmatprep.subr.bf16.mxu1 %v3153_v2 }
 0x56c   : > { %2719 = vmatpush3.bf16.msra.mxu1 %v3154_v23 }
 0x56d   : > { %2726 = vmatprep.subr.bf16.mxu1 %v3155_v29 }
 0x56f   : > { %2190 = vmatmul.mubr.bf16.vlgmr.msra.gmra.mrb[8].mxu1 %v1855_v27 }
 0x570   : > { %2727 = vmatpush3.bf16.msra.mxu1 %v3156_v33  ;;  %2670 = vmatprep.mubr.msk.bf16.mxu1 %vm3815_vm10, %v2669_v37 }
 0x571   : > { %2728 = vmatprep.subr.bf16.mxu1 %v3157_v34 }
 0x574   : > { %2729 = vmatpush3.bf16.msra.mxu1 %v3158_v39 }
 0x575   : > { %2730 = vmatprep.subr.bf16.mxu1 %v3159_v40 }
 0x578   : > { %2731 = vmatpush3.bf16.msra.mxu1 %v3160_v45 }
 0x579   : > { %2732 = vmatprep.subr.bf16.mxu1 %v3161_v52 }
 0x57c   : > { %2733 = vmatpush3.bf16.msra.mxu1 %v3162_v59 }
 0x57d   : > { %2734 = vmatprep.subr.bf16.mxu1 %v3163_v61 }
 0x580   : > { %2735 = vmatpush3.bf16.msra.mxu1 %v3164_v57 }
 0x581   : > { %2736 = vmatprep.subr.bf16.mxu1 %v3165_v62 }
 0x584   : > { %2737 = vmatpush3.bf16.msra.mxu1 %v3166_v3 }
 0x585   : > { %2738 = vmatprep.subr.bf16.mxu1 %v3167_v9 }
 0x588   : > { %2739 = vmatpush3.bf16.msra.mxu1 %v3168_v47 }
 0x589   : > { %2740 = vmatprep.subr.bf16.mxu1 %v3169_v56 }
 0x58c   : > { %2741 = vmatpush3.bf16.msra.mxu1 %v3170_v6 }
 0x58f   : > { %2673 = vmatmul.mubr.msk.bf16.vlgmr.msra.gmra.mrb[12].mxu1 %vm3815_vm10, %v2672_v26 }
 0x622   : > { %v2698_v12 = vpop.f32.mrb[4].mxu1 }
 0x623   : > { %v2699_v17 = vpop.f32.mrb[5].mxu1 }
 0x624   : > { %v2700_v19 = vadd.f32 %v2699_v17, %v2698_v12  ;;  %v2701_v41 = vpop.f32.mrb[6].mxu1 }
 0x625   : > { %v2702_v44 = vpop.f32.mrb[7].mxu1 }
 0x626   : > { %v2703_v15 = vadd.f32 %v2702_v44, %v2701_v41 }
 0x642   : > { %v2720_v51 = vpop.f32.mrb[8].mxu1 }
 0x643   : > { %v2721_v50 = vpop.f32.mrb[9].mxu1 }
 0x644   : > { %v2722_v54 = vadd.f32 %v2721_v50, %v2720_v51  ;;  %v2723_v58 = vpop.f32.mrb[10].mxu1 }
 0x645   : > { %v2724_v43 = vpop.f32.mrb[11].mxu1 }
 0x646   : > { %v2192_v63 = vadd.f32 %v2722_v54, %v2700_v19  ;;  %v2725_v55 = vadd.f32 %v2724_v43, %v2723_v58 }
 0x648   : > { %v2195_v48 = vadd.f32 %v2725_v55, %v2703_v15 }
 0x662   : > { %v2742_v53 = vpop.f32.mrb[12].mxu1 }
 0x663   : > { %v2743_v5 = vpop.f32.mrb[13].mxu1 }
 0x664   : > { %v2744_v27 = vadd.f32 %v2743_v5, %v2742_v53  ;;  %v2745_v18 = vpop.f32.mrb[14].mxu1 }
 0x665   : > { %v2746_v16 = vpop.f32.mrb[15].mxu1 }
 0x666   : > { %v2370_v11 = vadd.f32 %v2744_v27, %v2192_v63  ;;  %v2747_v22 = vadd.f32 %v2746_v16, %v2745_v18 }
 0x668   : > { %v2378_v4 = vadd.f32 %v2674_v1, %v2370_v11  ;;  %v2371_v28 = vadd.f32 %v2747_v22, %v2195_v48 }
 0x66a   : > { %2380 = vst [vmem:[%s450_s17] sm:$0xff] %v2378_v4  ;;  %v2379_v30 = vadd.f32 %v2674_v1, %v2371_v28 }
 0x66c   : > { %2381 = vst [vmem:[%s450_s17 + $0x8] sm:$0xff] %v2379_v30 }
 0x66d   : > { %3276 = shalt.err (!%p3273_p11)
}
 0x66e   : > { %s3277_s30 = scalar_lea.hbm %s3914_s18, 256  ;;  %s3281_s29 = scalar_lea.hbm %s4010_s6, 512 }
 0x66f   : > { %p3278_p13 = scmp.ne.s32.totalorder %s3914_s18, %s3277_s30  ;;  %p3282_p6 = scmp.lt.u32.totalorder %s3914_s18, %s4010_s6 }
 0x670   : > { %p3283_p9 = scmp.lt.u32.totalorder %s3281_s29, %s3277_s30  ;;  %p3285_p12 = scmp.lt.u32.totalorder %s3277_s30, %s3914_s18 }
 0x671   : > { %p3279_p5 = pnand %p3278_p13, %p4011_p1 }
 0x672   : > { %p3284_p10 = por %p3283_p9, %p3282_p6 }
 0x673   : > { %p3280_p0 = pneg %p3279_p5 }
 0x674   : > { %p3286_p2 = por %p3285_p12, %p3284_p10 }
 0x676   : > { %p3287_p3 = pnand %p3286_p2, %p3280_p0 }
 0x678   : > { %3290 = shalt.err (!%p3287_p3)
}
 0x679   : > { %s3350_s21 = smov 128  }
 0x67a   : > { %2896 = dma.vmem_to_hbm [thread:$0]  (%p4011_p1), %s3909_s20, 256, %s3914_s18, %s3916_s15, %s3350_s21, %s3350_s21, %s3346_s26  }
 0x67b PF: > { %s4012_s12 = sld [smem:[#allocation14_spill]]  ;;  %s4013_s24 = sld [smem:[#allocation12_spill]] }
 0x67c   : > { %s4014_s16 = sld [smem:[#allocation17_spill]] }
 0x681   : > { %p2918_p4 = scmp.ge.s32.totalorder %s4012_s12, 2  ;;  %s2411_s25 = sand.u32 1, %s4013_s24  }
 0x682   : > { %p4015_p7 = scmp.ne.s32.totalorder %s4014_s16, 0  ;;  %s2412_s14 = scalar_lea.sflag [#allocation4], %s2411_s25 }
 0x684   : > { %p2909_p8 = pnand %p2918_p4, %p4015_p7 }
 0x686   : > { %3316 = dma.done.wait (!%p2909_p8), %s2412_s14, 256  }
 0x687   : > { %3318 = vsyncadd (!%p2909_p8), %s2412_s14, 4294967040  ;;  %s4016_s24 = sld [smem:[#allocation15_spill]]  ;;  %s4017_s23 = sld [smem:[#allocation13_spill]] }
 0x688   : > { %s4018_s13 = sld [smem:[#allocation16_spill]]  ;;  %s4019_s21 = smov %s3325_s22 }
 0x68d   : > { %p24_p11 = scmp.ge.s32.totalorder %s4016_s24, 4   ;;  %s4020_s22 = smov %s4017_s23 }
 0x68e   : > { %s4021_s23 = smov %s4018_s13 }
 0x68f   :  { %26 = sbr.rel (!%p24_p11) target bundleno = 8 (0x8), region = 120 }
 0x696   :  { %2417 = vsyncpa [#allocation3], 1 }
 0x697   :  { %2419 = vsyncpa [#allocation3 + $0x1], 1 }
 0x698   :  { %2420 = vsyncpa [#allocation6], 1 }
 0x699   :  { %2421 = vsyncpa [#allocation4], 1 }
 0x69a   :  { %2423 = vsyncpa [#allocation4 + $0x1], 1 }

</bundles_post_ra>
